<compile_context>
chip_gen: v6e
topology: v6e:2x2x1
jax: 0.10.0
libtpu: 0.0.40
codegen_flags: <defaults>
</compile_context>

<pallas_src>
import jax
import jax.numpy as jnp
from jax.experimental import pallas as pl
from jax.experimental.pallas import tpu as pltpu


# ---------------------------------------------------------------------------
# Pallas kernel
# ---------------------------------------------------------------------------
def _spp_kernel(x_ref, out_ref):
    """Fused SPP for one (image, channel-tile) block, channels-last.

    x_ref  : (1, H, W, Ct)     input slab, channels in the 128-lane axis
    out_ref: (1, 4, H, W, Ct)  [x | pool3 | pool5 | pool7] stacked on axis 1
    """
    _, H, W, _ = x_ref.shape
    x = x_ref[0]                                   # (H, W, Ct)
    out_ref[0, 0] = x                              # identity branch of the concat

    def pool3_same(a, g):
        # 3x3 max pool, stride 1, "same" padding, computed separably.
        # Edge handling uses replicate-padding, which is equivalent to -inf
        # padding for max pooling (the replicated value is already in-window).
        # ---- 3-tap sliding max along H (major dim) into this pool's group ----
        out_ref[0, g, 1:H - 1] = jnp.maximum(
            jnp.maximum(a[0:H - 2], a[1:H - 1]), a[2:H])
        out_ref[0, g, 0:1] = jnp.maximum(a[0:1], a[1:2])
        out_ref[0, g, H - 1:H] = jnp.maximum(a[H - 2:H - 1], a[H - 1:H])
        m = out_ref[0, g]                          # load (value copy)
        # ---- 3-tap sliding max along W (sublane dim), written in place ----
        out_ref[0, g, :, 1:W - 1] = jnp.maximum(
            jnp.maximum(m[:, 0:W - 2], m[:, 1:W - 1]), m[:, 2:W])
        out_ref[0, g, :, 0:1] = jnp.maximum(m[:, 0:1], m[:, 1:2])
        out_ref[0, g, :, W - 1:W] = jnp.maximum(m[:, W - 2:W - 1], m[:, W - 1:W])
        return out_ref[0, g]

    p1 = pool3_same(x, 1)       # 3x3 same-pool
    p2 = pool3_same(p1, 2)      # 3x3 of 3x3  == 5x5 same-pool
    pool3_same(p2, 3)           # 3x3 of 5x5  == 7x7 same-pool


# ---------------------------------------------------------------------------
# Wrapper
# ---------------------------------------------------------------------------
def _pick_channel_tile(N, C, H, W, itemsize):
    """Largest lane-aligned channel tile that keeps the per-step VMEM modest."""
    budget = 8 * 1024 * 1024          # ~per-step single-buffer budget (bytes)
    per_c = 8 * H * W * itemsize      # in(1) + out(4) + ~3x temporaries / channel
    ct_max = max(1, budget // per_c)
    if C % 128 != 0:
        return C                      # small / unaligned C: take the whole axis
    ct = 128
    while ct * 2 <= min(C, ct_max) and C % (ct * 2) == 0:
        ct *= 2
    # Keep >=2 parallel grid steps so both v7x TensorCores get work at batch 1.
    while N * (C // ct) < 2 and ct >= 256:
        ct //= 2
    return ct


def spp(x):
    """x: (N, C, H, W) array -> (N, 4*C, H, W), matching torch SPP.forward."""
    N, C, H, W = x.shape
    assert H >= 3 and W >= 3, "SPP kernel expects spatial dims >= 3"

    Ct = _pick_channel_tile(N, C, H, W, x.dtype.itemsize)
    assert C % Ct == 0

    # NCHW -> NHWC so channels sit in the 128-lane axis inside the kernel.
    xl = jnp.transpose(x, (0, 2, 3, 1))            # (N, H, W, C)

    flops = int(12 * N * C * H * W)                # ~4 max-compares per 3x3 stage
    bytes_accessed = int(5 * N * C * H * W * x.dtype.itemsize)  # read x, write 4C

    out5 = pl.pallas_call(
        _spp_kernel,
        out_shape=jax.ShapeDtypeStruct((N, 4, H, W, C), x.dtype),
        grid_spec=pltpu.PrefetchScalarGridSpec(
            num_scalar_prefetch=0,
            grid=(N, C // Ct),
            in_specs=[pl.BlockSpec((1, H, W, Ct), lambda n, c: (n, 0, 0, c))],
            out_specs=pl.BlockSpec((1, 4, H, W, Ct),
                                   lambda n, c: (n, 0, 0, 0, c)),
        ),
        compiler_params=pltpu.CompilerParams(
            dimension_semantics=("parallel", "parallel"),
            vmem_limit_bytes=32 * 1024 * 1024),
        cost_estimate=pl.CostEstimate(
            flops=flops, transcendentals=0, bytes_accessed=bytes_accessed),
    )(xl)

    # (N, 4, H, W, C) -> (N, 4, C, H, W) -> (N, 4C, H, W): matches torch.cat
    # channel order [x | pool3 | pool5 | pool7].
    return jnp.transpose(out5, (0, 1, 4, 2, 3)).reshape(N, 4 * C, H, W)


# ---------------------------------------------------------------------------
# Pure-JAX reference (matches PyTorch: -inf padding for max pooling)
# ---------------------------------------------------------------------------
def _ref_maxpool_same(x, k):
    p = k // 2
    return jax.lax.reduce_window(
        x, -jnp.inf, jax.lax.max,
        window_dimensions=(1, 1, k, k),
        window_strides=(1, 1, 1, 1),
        padding=((0, 0), (0, 0), (p, p), (p, p)))


def spp_reference(x):
    return jnp.concatenate(
        [x,
         _ref_maxpool_same(x, 3),
         _ref_maxpool_same(x, 5),
         _ref_maxpool_same(x, 7)], axis=1)


# ---------------------------------------------------------------------------
if __name__ == "__main__":
    key = jax.random.PRNGKey(0)
    x = jax.random.normal(key, (2, 4, 16, 16), jnp.float32)   # NCHW, like PyTorch

    out = jax.block_until_ready(spp(x))
    assert out.shape == (2, 16, 16, 16), out.shape
    assert bool(jnp.all(jnp.isfinite(out)))

    ref = spp_reference(x)
    assert bool(jnp.allclose(out, ref, rtol=1e-6, atol=1e-6)), \
        float(jnp.max(jnp.abs(out - ref)))

    print("KERNEL_OK")
</pallas_src>

<mosaic_0001>
module attributes {stable_mosaic.version = 11 : i64} {
  func.func @_spp_kernel(%arg0: i32, %arg1: i32, %arg2: memref<1x16x16x4xf32, #tpu.memory_space<vmem>>, %arg3: memref<1x4x16x16x4xf32, #tpu.memory_space<vmem>>) attributes {dimension_semantics = [#tpu.dimension_semantics<parallel>, #tpu.dimension_semantics<parallel>], iteration_bounds = array<i64: 2, 1>, scalar_prefetch = 0 : i64, scratch_operands = 0 : i64, tpu.core_type = #tpu.core_type<tc>, window_params = [{transform_indices = @transform_0, window_bounds = array<i64: 1, 16, 16, 4>}, {transform_indices = @transform_1, window_bounds = array<i64: 1, 4, 16, 16, 4>}]} {
    %c0 = arith.constant 0 : index
    %c0_0 = arith.constant 0 : index
    %c0_1 = arith.constant 0 : index
    %c0_2 = arith.constant 0 : index
    %0 = vector.load %arg2[%c0, %c0_0, %c0_1, %c0_2] : memref<1x16x16x4xf32, #tpu.memory_space<vmem>>, vector<1x16x16x4xf32>
    %1 = vector.shape_cast %0 : vector<1x16x16x4xf32> to vector<16x16x4xf32>
    %c0_3 = arith.constant 0 : index
    %c0_4 = arith.constant 0 : index
    %c0_5 = arith.constant 0 : index
    %c0_6 = arith.constant 0 : index
    %c0_7 = arith.constant 0 : index
    %2 = vector.load %arg3[%c0_3, %c0_4, %c0_5, %c0_6, %c0_7] : memref<1x4x16x16x4xf32, #tpu.memory_space<vmem>>, vector<1x1x16x16x4xf32>
    %3 = vector.shape_cast %2 : vector<1x1x16x16x4xf32> to vector<16x16x4xf32>
    %4 = vector.shape_cast %1 : vector<16x16x4xf32> to vector<1x1x16x16x4xf32>
    tpu.vector_store %arg3[%c0_3, %c0_4, %c0_5, %c0_6, %c0_7], %4 {strides = array<i32>} : memref<1x4x16x16x4xf32, #tpu.memory_space<vmem>>, vector<1x1x16x16x4xf32>,
    %5 = vector.extract_strided_slice %1 {offsets = [0, 0, 0], sizes = [14, 16, 4], strides = [1, 1, 1]} : vector<16x16x4xf32> to vector<14x16x4xf32>
    %6 = vector.extract_strided_slice %1 {offsets = [1, 0, 0], sizes = [14, 16, 4], strides = [1, 1, 1]} : vector<16x16x4xf32> to vector<14x16x4xf32>
    %7 = arith.maximumf %5, %6 : vector<14x16x4xf32>
    %8 = vector.extract_strided_slice %1 {offsets = [2, 0, 0], sizes = [14, 16, 4], strides = [1, 1, 1]} : vector<16x16x4xf32> to vector<14x16x4xf32>
    %9 = arith.maximumf %7, %8 : vector<14x16x4xf32>
    %c0_8 = arith.constant 0 : index
    %c1 = arith.constant 1 : index
    %c1_9 = arith.constant 1 : index
    %c0_10 = arith.constant 0 : index
    %c0_11 = arith.constant 0 : index
    %10 = vector.load %arg3[%c0_8, %c1, %c1_9, %c0_10, %c0_11] : memref<1x4x16x16x4xf32, #tpu.memory_space<vmem>>, vector<1x1x14x16x4xf32>
    %11 = vector.shape_cast %10 : vector<1x1x14x16x4xf32> to vector<14x16x4xf32>
    %12 = vector.shape_cast %9 : vector<14x16x4xf32> to vector<1x1x14x16x4xf32>
    tpu.vector_store %arg3[%c0_8, %c1, %c1_9, %c0_10, %c0_11], %12 {strides = array<i32>} : memref<1x4x16x16x4xf32, #tpu.memory_space<vmem>>, vector<1x1x14x16x4xf32>,
    %13 = vector.extract_strided_slice %1 {offsets = [0, 0, 0], sizes = [1, 16, 4], strides = [1, 1, 1]} : vector<16x16x4xf32> to vector<1x16x4xf32>
    %14 = vector.extract_strided_slice %1 {offsets = [1, 0, 0], sizes = [1, 16, 4], strides = [1, 1, 1]} : vector<16x16x4xf32> to vector<1x16x4xf32>
    %15 = arith.maximumf %13, %14 : vector<1x16x4xf32>
    %c0_12 = arith.constant 0 : index
    %c1_13 = arith.constant 1 : index
    %c0_14 = arith.constant 0 : index
    %c0_15 = arith.constant 0 : index
    %c0_16 = arith.constant 0 : index
    %16 = vector.load %arg3[%c0_12, %c1_13, %c0_14, %c0_15, %c0_16] : memref<1x4x16x16x4xf32, #tpu.memory_space<vmem>>, vector<1x1x1x16x4xf32>
    %17 = vector.shape_cast %16 : vector<1x1x1x16x4xf32> to vector<1x16x4xf32>
    %18 = vector.shape_cast %15 : vector<1x16x4xf32> to vector<1x1x1x16x4xf32>
    tpu.vector_store %arg3[%c0_12, %c1_13, %c0_14, %c0_15, %c0_16], %18 {strides = array<i32>} : memref<1x4x16x16x4xf32, #tpu.memory_space<vmem>>, vector<1x1x1x16x4xf32>,
    %19 = vector.extract_strided_slice %1 {offsets = [14, 0, 0], sizes = [1, 16, 4], strides = [1, 1, 1]} : vector<16x16x4xf32> to vector<1x16x4xf32>
    %20 = vector.extract_strided_slice %1 {offsets = [15, 0, 0], sizes = [1, 16, 4], strides = [1, 1, 1]} : vector<16x16x4xf32> to vector<1x16x4xf32>
    %21 = arith.maximumf %19, %20 : vector<1x16x4xf32>
    %c0_17 = arith.constant 0 : index
    %c1_18 = arith.constant 1 : index
    %c15 = arith.constant 15 : index
    %c0_19 = arith.constant 0 : index
    %c0_20 = arith.constant 0 : index
    %22 = vector.load %arg3[%c0_17, %c1_18, %c15, %c0_19, %c0_20] : memref<1x4x16x16x4xf32, #tpu.memory_space<vmem>>, vector<1x1x1x16x4xf32>
    %23 = vector.shape_cast %22 : vector<1x1x1x16x4xf32> to vector<1x16x4xf32>
    %24 = vector.shape_cast %21 : vector<1x16x4xf32> to vector<1x1x1x16x4xf32>
    tpu.vector_store %arg3[%c0_17, %c1_18, %c15, %c0_19, %c0_20], %24 {strides = array<i32>} : memref<1x4x16x16x4xf32, #tpu.memory_space<vmem>>, vector<1x1x1x16x4xf32>,
    %c0_21 = arith.constant 0 : index
    %c1_22 = arith.constant 1 : index
    %c0_23 = arith.constant 0 : index
    %c0_24 = arith.constant 0 : index
    %c0_25 = arith.constant 0 : index
    %25 = vector.load %arg3[%c0_21, %c1_22, %c0_23, %c0_24, %c0_25] : memref<1x4x16x16x4xf32, #tpu.memory_space<vmem>>, vector<1x1x16x16x4xf32>
    %26 = vector.shape_cast %25 : vector<1x1x16x16x4xf32> to vector<16x16x4xf32>
    %27 = vector.extract_strided_slice %26 {offsets = [0, 0, 0], sizes = [16, 14, 4], strides = [1, 1, 1]} : vector<16x16x4xf32> to vector<16x14x4xf32>
    %28 = vector.extract_strided_slice %26 {offsets = [0, 1, 0], sizes = [16, 14, 4], strides = [1, 1, 1]} : vector<16x16x4xf32> to vector<16x14x4xf32>
    %29 = arith.maximumf %27, %28 : vector<16x14x4xf32>
    %30 = vector.extract_strided_slice %26 {offsets = [0, 2, 0], sizes = [16, 14, 4], strides = [1, 1, 1]} : vector<16x16x4xf32> to vector<16x14x4xf32>
    %31 = arith.maximumf %29, %30 : vector<16x14x4xf32>
    %c0_26 = arith.constant 0 : index
    %c1_27 = arith.constant 1 : index
    %c0_28 = arith.constant 0 : index
    %c1_29 = arith.constant 1 : index
    %c0_30 = arith.constant 0 : index
    %32 = vector.load %arg3[%c0_26, %c1_27, %c0_28, %c1_29, %c0_30] : memref<1x4x16x16x4xf32, #tpu.memory_space<vmem>>, vector<1x1x16x14x4xf32>
    %33 = vector.shape_cast %32 : vector<1x1x16x14x4xf32> to vector<16x14x4xf32>
    %34 = vector.shape_cast %31 : vector<16x14x4xf32> to vector<1x1x16x14x4xf32>
    tpu.vector_store %arg3[%c0_26, %c1_27, %c0_28, %c1_29, %c0_30], %34 {strides = array<i32>} : memref<1x4x16x16x4xf32, #tpu.memory_space<vmem>>, vector<1x1x16x14x4xf32>,
    %35 = vector.extract_strided_slice %26 {offsets = [0, 0, 0], sizes = [16, 1, 4], strides = [1, 1, 1]} : vector<16x16x4xf32> to vector<16x1x4xf32>
    %36 = vector.extract_strided_slice %26 {offsets = [0, 1, 0], sizes = [16, 1, 4], strides = [1, 1, 1]} : vector<16x16x4xf32> to vector<16x1x4xf32>
    %37 = arith.maximumf %35, %36 : vector<16x1x4xf32>
    %c0_31 = arith.constant 0 : index
    %c1_32 = arith.constant 1 : index
    %c0_33 = arith.constant 0 : index
    %c0_34 = arith.constant 0 : index
    %c0_35 = arith.constant 0 : index
    %38 = vector.load %arg3[%c0_31, %c1_32, %c0_33, %c0_34, %c0_35] : memref<1x4x16x16x4xf32, #tpu.memory_space<vmem>>, vector<1x1x16x1x4xf32>
    %39 = vector.shape_cast %38 : vector<1x1x16x1x4xf32> to vector<16x1x4xf32>
    %40 = vector.shape_cast %37 : vector<16x1x4xf32> to vector<1x1x16x1x4xf32>
    tpu.vector_store %arg3[%c0_31, %c1_32, %c0_33, %c0_34, %c0_35], %40 {strides = array<i32>} : memref<1x4x16x16x4xf32, #tpu.memory_space<vmem>>, vector<1x1x16x1x4xf32>,
    %41 = vector.extract_strided_slice %26 {offsets = [0, 14, 0], sizes = [16, 1, 4], strides = [1, 1, 1]} : vector<16x16x4xf32> to vector<16x1x4xf32>
    %42 = vector.extract_strided_slice %26 {offsets = [0, 15, 0], sizes = [16, 1, 4], strides = [1, 1, 1]} : vector<16x16x4xf32> to vector<16x1x4xf32>
    %43 = arith.maximumf %41, %42 : vector<16x1x4xf32>
    %c0_36 = arith.constant 0 : index
    %c1_37 = arith.constant 1 : index
    %c0_38 = arith.constant 0 : index
    %c15_39 = arith.constant 15 : index
    %c0_40 = arith.constant 0 : index
    %44 = vector.load %arg3[%c0_36, %c1_37, %c0_38, %c15_39, %c0_40] : memref<1x4x16x16x4xf32, #tpu.memory_space<vmem>>, vector<1x1x16x1x4xf32>
    %45 = vector.shape_cast %44 : vector<1x1x16x1x4xf32> to vector<16x1x4xf32>
    %46 = vector.shape_cast %43 : vector<16x1x4xf32> to vector<1x1x16x1x4xf32>
    tpu.vector_store %arg3[%c0_36, %c1_37, %c0_38, %c15_39, %c0_40], %46 {strides = array<i32>} : memref<1x4x16x16x4xf32, #tpu.memory_space<vmem>>, vector<1x1x16x1x4xf32>,
    %c0_41 = arith.constant 0 : index
    %c1_42 = arith.constant 1 : index
    %c0_43 = arith.constant 0 : index
    %c0_44 = arith.constant 0 : index
    %c0_45 = arith.constant 0 : index
    %47 = vector.load %arg3[%c0_41, %c1_42, %c0_43, %c0_44, %c0_45] : memref<1x4x16x16x4xf32, #tpu.memory_space<vmem>>, vector<1x1x16x16x4xf32>
    %48 = vector.shape_cast %47 : vector<1x1x16x16x4xf32> to vector<16x16x4xf32>
    %49 = vector.extract_strided_slice %48 {offsets = [0, 0, 0], sizes = [14, 16, 4], strides = [1, 1, 1]} : vector<16x16x4xf32> to vector<14x16x4xf32>
    %50 = vector.extract_strided_slice %48 {offsets = [1, 0, 0], sizes = [14, 16, 4], strides = [1, 1, 1]} : vector<16x16x4xf32> to vector<14x16x4xf32>
    %51 = arith.maximumf %49, %50 : vector<14x16x4xf32>
    %52 = vector.extract_strided_slice %48 {offsets = [2, 0, 0], sizes = [14, 16, 4], strides = [1, 1, 1]} : vector<16x16x4xf32> to vector<14x16x4xf32>
    %53 = arith.maximumf %51, %52 : vector<14x16x4xf32>
    %c0_46 = arith.constant 0 : index
    %c2 = arith.constant 2 : index
    %c1_47 = arith.constant 1 : index
    %c0_48 = arith.constant 0 : index
    %c0_49 = arith.constant 0 : index
    %54 = vector.load %arg3[%c0_46, %c2, %c1_47, %c0_48, %c0_49] : memref<1x4x16x16x4xf32, #tpu.memory_space<vmem>>, vector<1x1x14x16x4xf32>
    %55 = vector.shape_cast %54 : vector<1x1x14x16x4xf32> to vector<14x16x4xf32>
    %56 = vector.shape_cast %53 : vector<14x16x4xf32> to vector<1x1x14x16x4xf32>
    tpu.vector_store %arg3[%c0_46, %c2, %c1_47, %c0_48, %c0_49], %56 {strides = array<i32>} : memref<1x4x16x16x4xf32, #tpu.memory_space<vmem>>, vector<1x1x14x16x4xf32>,
    %57 = vector.extract_strided_slice %48 {offsets = [0, 0, 0], sizes = [1, 16, 4], strides = [1, 1, 1]} : vector<16x16x4xf32> to vector<1x16x4xf32>
    %58 = vector.extract_strided_slice %48 {offsets = [1, 0, 0], sizes = [1, 16, 4], strides = [1, 1, 1]} : vector<16x16x4xf32> to vector<1x16x4xf32>
    %59 = arith.maximumf %57, %58 : vector<1x16x4xf32>
    %c0_50 = arith.constant 0 : index
    %c2_51 = arith.constant 2 : index
    %c0_52 = arith.constant 0 : index
    %c0_53 = arith.constant 0 : index
    %c0_54 = arith.constant 0 : index
    %60 = vector.load %arg3[%c0_50, %c2_51, %c0_52, %c0_53, %c0_54] : memref<1x4x16x16x4xf32, #tpu.memory_space<vmem>>, vector<1x1x1x16x4xf32>
    %61 = vector.shape_cast %60 : vector<1x1x1x16x4xf32> to vector<1x16x4xf32>
    %62 = vector.shape_cast %59 : vector<1x16x4xf32> to vector<1x1x1x16x4xf32>
    tpu.vector_store %arg3[%c0_50, %c2_51, %c0_52, %c0_53, %c0_54], %62 {strides = array<i32>} : memref<1x4x16x16x4xf32, #tpu.memory_space<vmem>>, vector<1x1x1x16x4xf32>,
    %63 = vector.extract_strided_slice %48 {offsets = [14, 0, 0], sizes = [1, 16, 4], strides = [1, 1, 1]} : vector<16x16x4xf32> to vector<1x16x4xf32>
    %64 = vector.extract_strided_slice %48 {offsets = [15, 0, 0], sizes = [1, 16, 4], strides = [1, 1, 1]} : vector<16x16x4xf32> to vector<1x16x4xf32>
    %65 = arith.maximumf %63, %64 : vector<1x16x4xf32>
    %c0_55 = arith.constant 0 : index
    %c2_56 = arith.constant 2 : index
    %c15_57 = arith.constant 15 : index
    %c0_58 = arith.constant 0 : index
    %c0_59 = arith.constant 0 : index
    %66 = vector.load %arg3[%c0_55, %c2_56, %c15_57, %c0_58, %c0_59] : memref<1x4x16x16x4xf32, #tpu.memory_space<vmem>>, vector<1x1x1x16x4xf32>
    %67 = vector.shape_cast %66 : vector<1x1x1x16x4xf32> to vector<1x16x4xf32>
    %68 = vector.shape_cast %65 : vector<1x16x4xf32> to vector<1x1x1x16x4xf32>
    tpu.vector_store %arg3[%c0_55, %c2_56, %c15_57, %c0_58, %c0_59], %68 {strides = array<i32>} : memref<1x4x16x16x4xf32, #tpu.memory_space<vmem>>, vector<1x1x1x16x4xf32>,
    %c0_60 = arith.constant 0 : index
    %c2_61 = arith.constant 2 : index
    %c0_62 = arith.constant 0 : index
    %c0_63 = arith.constant 0 : index
    %c0_64 = arith.constant 0 : index
    %69 = vector.load %arg3[%c0_60, %c2_61, %c0_62, %c0_63, %c0_64] : memref<1x4x16x16x4xf32, #tpu.memory_space<vmem>>, vector<1x1x16x16x4xf32>
    %70 = vector.shape_cast %69 : vector<1x1x16x16x4xf32> to vector<16x16x4xf32>
    %71 = vector.extract_strided_slice %70 {offsets = [0, 0, 0], sizes = [16, 14, 4], strides = [1, 1, 1]} : vector<16x16x4xf32> to vector<16x14x4xf32>
    %72 = vector.extract_strided_slice %70 {offsets = [0, 1, 0], sizes = [16, 14, 4], strides = [1, 1, 1]} : vector<16x16x4xf32> to vector<16x14x4xf32>
    %73 = arith.maximumf %71, %72 : vector<16x14x4xf32>
    %74 = vector.extract_strided_slice %70 {offsets = [0, 2, 0], sizes = [16, 14, 4], strides = [1, 1, 1]} : vector<16x16x4xf32> to vector<16x14x4xf32>
    %75 = arith.maximumf %73, %74 : vector<16x14x4xf32>
    %c0_65 = arith.constant 0 : index
    %c2_66 = arith.constant 2 : index
    %c0_67 = arith.constant 0 : index
    %c1_68 = arith.constant 1 : index
    %c0_69 = arith.constant 0 : index
    %76 = vector.load %arg3[%c0_65, %c2_66, %c0_67, %c1_68, %c0_69] : memref<1x4x16x16x4xf32, #tpu.memory_space<vmem>>, vector<1x1x16x14x4xf32>
    %77 = vector.shape_cast %76 : vector<1x1x16x14x4xf32> to vector<16x14x4xf32>
    %78 = vector.shape_cast %75 : vector<16x14x4xf32> to vector<1x1x16x14x4xf32>
    tpu.vector_store %arg3[%c0_65, %c2_66, %c0_67, %c1_68, %c0_69], %78 {strides = array<i32>} : memref<1x4x16x16x4xf32, #tpu.memory_space<vmem>>, vector<1x1x16x14x4xf32>,
    %79 = vector.extract_strided_slice %70 {offsets = [0, 0, 0], sizes = [16, 1, 4], strides = [1, 1, 1]} : vector<16x16x4xf32> to vector<16x1x4xf32>
    %80 = vector.extract_strided_slice %70 {offsets = [0, 1, 0], sizes = [16, 1, 4], strides = [1, 1, 1]} : vector<16x16x4xf32> to vector<16x1x4xf32>
    %81 = arith.maximumf %79, %80 : vector<16x1x4xf32>
    %c0_70 = arith.constant 0 : index
    %c2_71 = arith.constant 2 : index
    %c0_72 = arith.constant 0 : index
    %c0_73 = arith.constant 0 : index
    %c0_74 = arith.constant 0 : index
    %82 = vector.load %arg3[%c0_70, %c2_71, %c0_72, %c0_73, %c0_74] : memref<1x4x16x16x4xf32, #tpu.memory_space<vmem>>, vector<1x1x16x1x4xf32>
    %83 = vector.shape_cast %82 : vector<1x1x16x1x4xf32> to vector<16x1x4xf32>
    %84 = vector.shape_cast %81 : vector<16x1x4xf32> to vector<1x1x16x1x4xf32>
    tpu.vector_store %arg3[%c0_70, %c2_71, %c0_72, %c0_73, %c0_74], %84 {strides = array<i32>} : memref<1x4x16x16x4xf32, #tpu.memory_space<vmem>>, vector<1x1x16x1x4xf32>,
    %85 = vector.extract_strided_slice %70 {offsets = [0, 14, 0], sizes = [16, 1, 4], strides = [1, 1, 1]} : vector<16x16x4xf32> to vector<16x1x4xf32>
    %86 = vector.extract_strided_slice %70 {offsets = [0, 15, 0], sizes = [16, 1, 4], strides = [1, 1, 1]} : vector<16x16x4xf32> to vector<16x1x4xf32>
    %87 = arith.maximumf %85, %86 : vector<16x1x4xf32>
    %c0_75 = arith.constant 0 : index
    %c2_76 = arith.constant 2 : index
    %c0_77 = arith.constant 0 : index
    %c15_78 = arith.constant 15 : index
    %c0_79 = arith.constant 0 : index
    %88 = vector.load %arg3[%c0_75, %c2_76, %c0_77, %c15_78, %c0_79] : memref<1x4x16x16x4xf32, #tpu.memory_space<vmem>>, vector<1x1x16x1x4xf32>
    %89 = vector.shape_cast %88 : vector<1x1x16x1x4xf32> to vector<16x1x4xf32>
    %90 = vector.shape_cast %87 : vector<16x1x4xf32> to vector<1x1x16x1x4xf32>
    tpu.vector_store %arg3[%c0_75, %c2_76, %c0_77, %c15_78, %c0_79], %90 {strides = array<i32>} : memref<1x4x16x16x4xf32, #tpu.memory_space<vmem>>, vector<1x1x16x1x4xf32>,
    %c0_80 = arith.constant 0 : index
    %c2_81 = arith.constant 2 : index
    %c0_82 = arith.constant 0 : index
    %c0_83 = arith.constant 0 : index
    %c0_84 = arith.constant 0 : index
    %91 = vector.load %arg3[%c0_80, %c2_81, %c0_82, %c0_83, %c0_84] : memref<1x4x16x16x4xf32, #tpu.memory_space<vmem>>, vector<1x1x16x16x4xf32>
    %92 = vector.shape_cast %91 : vector<1x1x16x16x4xf32> to vector<16x16x4xf32>
    %93 = vector.extract_strided_slice %92 {offsets = [0, 0, 0], sizes = [14, 16, 4], strides = [1, 1, 1]} : vector<16x16x4xf32> to vector<14x16x4xf32>
    %94 = vector.extract_strided_slice %92 {offsets = [1, 0, 0], sizes = [14, 16, 4], strides = [1, 1, 1]} : vector<16x16x4xf32> to vector<14x16x4xf32>
    %95 = arith.maximumf %93, %94 : vector<14x16x4xf32>
    %96 = vector.extract_strided_slice %92 {offsets = [2, 0, 0], sizes = [14, 16, 4], strides = [1, 1, 1]} : vector<16x16x4xf32> to vector<14x16x4xf32>
    %97 = arith.maximumf %95, %96 : vector<14x16x4xf32>
    %c0_85 = arith.constant 0 : index
    %c3 = arith.constant 3 : index
    %c1_86 = arith.constant 1 : index
    %c0_87 = arith.constant 0 : index
    %c0_88 = arith.constant 0 : index
    %98 = vector.load %arg3[%c0_85, %c3, %c1_86, %c0_87, %c0_88] : memref<1x4x16x16x4xf32, #tpu.memory_space<vmem>>, vector<1x1x14x16x4xf32>
    %99 = vector.shape_cast %98 : vector<1x1x14x16x4xf32> to vector<14x16x4xf32>
    %100 = vector.shape_cast %97 : vector<14x16x4xf32> to vector<1x1x14x16x4xf32>
    tpu.vector_store %arg3[%c0_85, %c3, %c1_86, %c0_87, %c0_88], %100 {strides = array<i32>} : memref<1x4x16x16x4xf32, #tpu.memory_space<vmem>>, vector<1x1x14x16x4xf32>,
    %101 = vector.extract_strided_slice %92 {offsets = [0, 0, 0], sizes = [1, 16, 4], strides = [1, 1, 1]} : vector<16x16x4xf32> to vector<1x16x4xf32>
    %102 = vector.extract_strided_slice %92 {offsets = [1, 0, 0], sizes = [1, 16, 4], strides = [1, 1, 1]} : vector<16x16x4xf32> to vector<1x16x4xf32>
    %103 = arith.maximumf %101, %102 : vector<1x16x4xf32>
    %c0_89 = arith.constant 0 : index
    %c3_90 = arith.constant 3 : index
    %c0_91 = arith.constant 0 : index
    %c0_92 = arith.constant 0 : index
    %c0_93 = arith.constant 0 : index
    %104 = vector.load %arg3[%c0_89, %c3_90, %c0_91, %c0_92, %c0_93] : memref<1x4x16x16x4xf32, #tpu.memory_space<vmem>>, vector<1x1x1x16x4xf32>
    %105 = vector.shape_cast %104 : vector<1x1x1x16x4xf32> to vector<1x16x4xf32>
    %106 = vector.shape_cast %103 : vector<1x16x4xf32> to vector<1x1x1x16x4xf32>
    tpu.vector_store %arg3[%c0_89, %c3_90, %c0_91, %c0_92, %c0_93], %106 {strides = array<i32>} : memref<1x4x16x16x4xf32, #tpu.memory_space<vmem>>, vector<1x1x1x16x4xf32>,
    %107 = vector.extract_strided_slice %92 {offsets = [14, 0, 0], sizes = [1, 16, 4], strides = [1, 1, 1]} : vector<16x16x4xf32> to vector<1x16x4xf32>
    %108 = vector.extract_strided_slice %92 {offsets = [15, 0, 0], sizes = [1, 16, 4], strides = [1, 1, 1]} : vector<16x16x4xf32> to vector<1x16x4xf32>
    %109 = arith.maximumf %107, %108 : vector<1x16x4xf32>
    %c0_94 = arith.constant 0 : index
    %c3_95 = arith.constant 3 : index
    %c15_96 = arith.constant 15 : index
    %c0_97 = arith.constant 0 : index
    %c0_98 = arith.constant 0 : index
    %110 = vector.load %arg3[%c0_94, %c3_95, %c15_96, %c0_97, %c0_98] : memref<1x4x16x16x4xf32, #tpu.memory_space<vmem>>, vector<1x1x1x16x4xf32>
    %111 = vector.shape_cast %110 : vector<1x1x1x16x4xf32> to vector<1x16x4xf32>
    %112 = vector.shape_cast %109 : vector<1x16x4xf32> to vector<1x1x1x16x4xf32>
    tpu.vector_store %arg3[%c0_94, %c3_95, %c15_96, %c0_97, %c0_98], %112 {strides = array<i32>} : memref<1x4x16x16x4xf32, #tpu.memory_space<vmem>>, vector<1x1x1x16x4xf32>,
    %c0_99 = arith.constant 0 : index
    %c3_100 = arith.constant 3 : index
    %c0_101 = arith.constant 0 : index
    %c0_102 = arith.constant 0 : index
    %c0_103 = arith.constant 0 : index
    %113 = vector.load %arg3[%c0_99, %c3_100, %c0_101, %c0_102, %c0_103] : memref<1x4x16x16x4xf32, #tpu.memory_space<vmem>>, vector<1x1x16x16x4xf32>
    %114 = vector.shape_cast %113 : vector<1x1x16x16x4xf32> to vector<16x16x4xf32>
    %115 = vector.extract_strided_slice %114 {offsets = [0, 0, 0], sizes = [16, 14, 4], strides = [1, 1, 1]} : vector<16x16x4xf32> to vector<16x14x4xf32>
    %116 = vector.extract_strided_slice %114 {offsets = [0, 1, 0], sizes = [16, 14, 4], strides = [1, 1, 1]} : vector<16x16x4xf32> to vector<16x14x4xf32>
    %117 = arith.maximumf %115, %116 : vector<16x14x4xf32>
    %118 = vector.extract_strided_slice %114 {offsets = [0, 2, 0], sizes = [16, 14, 4], strides = [1, 1, 1]} : vector<16x16x4xf32> to vector<16x14x4xf32>
    %119 = arith.maximumf %117, %118 : vector<16x14x4xf32>
    %c0_104 = arith.constant 0 : index
    %c3_105 = arith.constant 3 : index
    %c0_106 = arith.constant 0 : index
    %c1_107 = arith.constant 1 : index
    %c0_108 = arith.constant 0 : index
    %120 = vector.load %arg3[%c0_104, %c3_105, %c0_106, %c1_107, %c0_108] : memref<1x4x16x16x4xf32, #tpu.memory_space<vmem>>, vector<1x1x16x14x4xf32>
    %121 = vector.shape_cast %120 : vector<1x1x16x14x4xf32> to vector<16x14x4xf32>
    %122 = vector.shape_cast %119 : vector<16x14x4xf32> to vector<1x1x16x14x4xf32>
    tpu.vector_store %arg3[%c0_104, %c3_105, %c0_106, %c1_107, %c0_108], %122 {strides = array<i32>} : memref<1x4x16x16x4xf32, #tpu.memory_space<vmem>>, vector<1x1x16x14x4xf32>,
    %123 = vector.extract_strided_slice %114 {offsets = [0, 0, 0], sizes = [16, 1, 4], strides = [1, 1, 1]} : vector<16x16x4xf32> to vector<16x1x4xf32>
    %124 = vector.extract_strided_slice %114 {offsets = [0, 1, 0], sizes = [16, 1, 4], strides = [1, 1, 1]} : vector<16x16x4xf32> to vector<16x1x4xf32>
    %125 = arith.maximumf %123, %124 : vector<16x1x4xf32>
    %c0_109 = arith.constant 0 : index
    %c3_110 = arith.constant 3 : index
    %c0_111 = arith.constant 0 : index
    %c0_112 = arith.constant 0 : index
    %c0_113 = arith.constant 0 : index
    %126 = vector.load %arg3[%c0_109, %c3_110, %c0_111, %c0_112, %c0_113] : memref<1x4x16x16x4xf32, #tpu.memory_space<vmem>>, vector<1x1x16x1x4xf32>
    %127 = vector.shape_cast %126 : vector<1x1x16x1x4xf32> to vector<16x1x4xf32>
    %128 = vector.shape_cast %125 : vector<16x1x4xf32> to vector<1x1x16x1x4xf32>
    tpu.vector_store %arg3[%c0_109, %c3_110, %c0_111, %c0_112, %c0_113], %128 {strides = array<i32>} : memref<1x4x16x16x4xf32, #tpu.memory_space<vmem>>, vector<1x1x16x1x4xf32>,
    %129 = vector.extract_strided_slice %114 {offsets = [0, 14, 0], sizes = [16, 1, 4], strides = [1, 1, 1]} : vector<16x16x4xf32> to vector<16x1x4xf32>
    %130 = vector.extract_strided_slice %114 {offsets = [0, 15, 0], sizes = [16, 1, 4], strides = [1, 1, 1]} : vector<16x16x4xf32> to vector<16x1x4xf32>
    %131 = arith.maximumf %129, %130 : vector<16x1x4xf32>
    %c0_114 = arith.constant 0 : index
    %c3_115 = arith.constant 3 : index
    %c0_116 = arith.constant 0 : index
    %c15_117 = arith.constant 15 : index
    %c0_118 = arith.constant 0 : index
    %132 = vector.load %arg3[%c0_114, %c3_115, %c0_116, %c15_117, %c0_118] : memref<1x4x16x16x4xf32, #tpu.memory_space<vmem>>, vector<1x1x16x1x4xf32>
    %133 = vector.shape_cast %132 : vector<1x1x16x1x4xf32> to vector<16x1x4xf32>
    %134 = vector.shape_cast %131 : vector<16x1x4xf32> to vector<1x1x16x1x4xf32>
    tpu.vector_store %arg3[%c0_114, %c3_115, %c0_116, %c15_117, %c0_118], %134 {strides = array<i32>} : memref<1x4x16x16x4xf32, #tpu.memory_space<vmem>>, vector<1x1x16x1x4xf32>,
    return
  }
  func.func @transform_0(%arg0: i32, %arg1: i32) -> (i32, i32, i32, i32) {
    %c0_i32 = arith.constant 0 : i32
    %c0_i32_0 = arith.constant 0 : i32
    %c0_i32_1 = arith.constant 0 : i32
    return %arg0, %c0_i32, %c0_i32_0, %arg1 : i32, i32, i32, i32
  }
  func.func @transform_1(%arg0: i32, %arg1: i32) -> (i32, i32, i32, i32, i32) {
    %c0_i32 = arith.constant 0 : i32
    %c0_i32_0 = arith.constant 0 : i32
    %c0_i32_1 = arith.constant 0 : i32
    %c0_i32_2 = arith.constant 0 : i32
    return %arg0, %c0_i32, %c0_i32_0, %c0_i32_1, %arg1 : i32, i32, i32, i32, i32
  }
}

</mosaic_0001>

<bundles_post_ra>
// kernel: tpu_custom_call.1
= control target key start
LH: loop header
LB: loop body
LE: loop exit
PB: predicated region body
PF: predicated region fallthrough
CT: control target
= control target key end

     0   :  { %s2315_s6 = smov 0   ;;  %s2317_s7 = smov 0   ;;  %s4454_s0 = inlined_call_operand.vmem [shape: f32[2,16,16,4], index: 0, kind: input, shape index: {}]   ;;  %s4455_s1 = inlined_call_operand.vmem [shape: f32[2,4,16,16,4], index: 1, kind: output, shape index: {}]  }
   0x1   :  { %s2319_s8 = smov 0  }
   0x2 LB: > { %s23_s9 = sadd.s32 1, %s2299_s7  ;;  %p1800_p0 = scmp.ge.s32.totalorder %s2303_s8, 1  ;;  %s2303_s8 = sphi %s2319_s8, %s11_s8   ;;  %s2299_s7 = sphi %s2317_s7, %s4562_s7   ;;  %s2295_s6 = sphi %s2315_s6, %s4561_s6  }
   0x3   : > { %p25_p1 = scmp.ge.s32.totalorder %s23_s9, 2  ;;  %p106_p2 = scmp.lt.s32.totalorder %s2303_s8, 3 }
   0x5   : > { %s4564_s9 = smov (%p25_p1, %s23_s9), 0  ;;  %p107_p3 = pnand %p1800_p0, %p106_p2 }
   0x7   : > { %110 = sbr.rel (%p107_p3) target bundleno = 222 (0xde), region = 24 }
   0xc   : > { %p132_p4 = scmp.lt.s32.totalorder %s2295_s6, 1  ;;  %vm180_vm0 = vcmask 31744   ;;  %vm370_vm1 = vcmask 1046528   ;;  %vm483_vm2 = vcmask 1045504   ;;  %vm661_vm3 = vcmask 24576  }
   0xd   : > { %vm678_vm4 = vcmask 30726   ;;  %vm597_vm5 = vcmask 29696  }
   0xe   : > { %s4566_s6 = smov (!%p132_p4, %s2295_s6), 1 }
   0xf   : > { %s2255_s10 = sshll.u32 %s4566_s6, 8  ;;  %s2256_s11 = sshll.u32 %s4566_s6, 10 }
  0x10   : > { %s2336_s14 = scalar_lea.vmem %s4454_s0, %s2255_s10  ;;  %s2341_s17 = scalar_lea.vmem %s4455_s1, %s2256_s11 }
  0x11   : > { %v148_v0 = vld [vmem:[%s2336_s14] sm:$0xff]  ;;  %v150_v1 = vld [vmem:[%s2336_s14 + $0x10] sm:$0xff]  ;;  %v149_v2 = vld [vmem:[%s2336_s14 + $0x8] sm:$0xff] }
  0x12   : > { %v213_v3 = vmax.f32 %v148_v0, %v150_v1  ;;  %181 = vst.msk [vmem:[%s2341_s17] sm:$0xff] %vm180_vm0, %v148_v0  ;;  %183 = vst.msk [vmem:[%s2341_s17 + $0x10] sm:$0xff] %vm180_vm0, %v150_v1  ;;  %v151_v4 = vld [vmem:[%s2336_s14 + $0x18] sm:$0xff]  ;;  %v2354_v5 = vld [vmem:[%s2336_s14 + $0xe0] sm:$0xff] }
  0x13   : > { %182 = vst.msk [vmem:[%s2341_s17 + $0x8] sm:$0xff] %vm180_vm0, %v149_v2  ;;  %v2357_v6 = vld [vmem:[%s2336_s14 + $0xf0] sm:$0xff]  ;;  %v214_v7 = vmax.f32 %v149_v2, %v151_v4  ;;  %184 = vst.msk [vmem:[%s2341_s17 + $0x18] sm:$0xff] %vm180_vm0, %v151_v4  ;;  %v2370_v9 = vld [vmem:[%s2336_s14 + $0xe8] sm:$0xff] }
  0x14   : > { %v301_v8 = vmax.f32 %v2354_v5, %v2357_v6  ;;  %209 = vst.msk [vmem:[%s2341_s17 + $0xe0] sm:$0xff] %vm180_vm0, %v2354_v5  ;;  %211 = vst.msk [vmem:[%s2341_s17 + $0xf0] sm:$0xff] %vm180_vm0, %v2357_v6  ;;  %v2373_v10 = vld [vmem:[%s2336_s14 + $0xf8] sm:$0xff]  ;;  %v152_v11 = vld [vmem:[%s2336_s14 + $0x20] sm:$0xff] }
  0x15   : > { %1833 = vst.msk [vmem:[%s2341_s17 + $0x100] sm:$0xff] %vm180_vm0, %v213_v3  ;;  %v302_v12 = vmax.f32 %v2370_v9, %v2373_v10  ;;  %210 = vst.msk [vmem:[%s2341_s17 + $0xe8] sm:$0xff] %vm180_vm0, %v2370_v9  ;;  %v241_v13 = vmax.f32 %v213_v3, %v152_v11  ;;  %v153_v14 = vld [vmem:[%s2336_s14 + $0x28] sm:$0xff]  ;;  %v154_v15 = vld [vmem:[%s2336_s14 + $0x30] sm:$0xff]  ;;  %v215_v16 = vmax.f32 %v150_v1, %v152_v11 }
  0x16   : > { %212 = vst.msk [vmem:[%s2341_s17 + $0xf8] sm:$0xff] %vm180_vm0, %v2373_v10  ;;  %185 = vst.msk [vmem:[%s2341_s17 + $0x20] sm:$0xff] %vm180_vm0, %v152_v11  ;;  %v155_v17 = vld [vmem:[%s2336_s14 + $0x38] sm:$0xff]  ;;  %v242_v18 = vmax.f32 %v214_v7, %v153_v14  ;;  %v216_v19 = vmax.f32 %v151_v4, %v153_v14  ;;  %v156_v20 = vld [vmem:[%s2336_s14 + $0x40] sm:$0xff]  ;;  %v217_v21 = vmax.f32 %v152_v11, %v154_v15 }
  0x17   : > { %1834 = vst.msk [vmem:[%s2341_s17 + $0x108] sm:$0xff] %vm180_vm0, %v214_v7  ;;  %1835 = vst.msk [vmem:[%s2341_s17 + $0x1f0] sm:$0xff] %vm180_vm0, %v301_v8  ;;  %v157_v22 = vld [vmem:[%s2336_s14 + $0x48] sm:$0xff]  ;;  %v218_v23 = vmax.f32 %v153_v14, %v155_v17  ;;  %v158_v24 = vld [vmem:[%s2336_s14 + $0x50] sm:$0xff]  ;;  %v243_v25 = vmax.f32 %v215_v16, %v154_v15  ;;  %v219_v26 = vmax.f32 %v154_v15, %v156_v20 }
  0x18   : > { %186 = vst.msk [vmem:[%s2341_s17 + $0x28] sm:$0xff] %vm180_vm0, %v153_v14  ;;  %187 = vst.msk [vmem:[%s2341_s17 + $0x30] sm:$0xff] %vm180_vm0, %v154_v15  ;;  %v159_v27 = vld [vmem:[%s2336_s14 + $0x58] sm:$0xff]  ;;  %v220_v28 = vmax.f32 %v155_v17, %v157_v22  ;;  %v160_v29 = vld [vmem:[%s2336_s14 + $0x60] sm:$0xff]  ;;  %v221_v30 = vmax.f32 %v156_v20, %v158_v24  ;;  %v244_v32 = vmax.f32 %v216_v19, %v155_v17 }
  0x19   : > { %188 = vst.msk [vmem:[%s2341_s17 + $0x38] sm:$0xff] %vm180_vm0, %v155_v17  ;;  %1836 = vst.msk [vmem:[%s2341_s17 + $0x1f8] sm:$0xff] %vm180_vm0, %v302_v12  ;;  %v161_v31 = vld [vmem:[%s2336_s14 + $0x68] sm:$0xff]  ;;  %v245_v33 = vmax.f32 %v217_v21, %v156_v20  ;;  %v246_v34 = vmax.f32 %v218_v23, %v157_v22  ;;  %v222_v35 = vmax.f32 %v157_v22, %v159_v27  ;;  %v162_v36 = vld [vmem:[%s2336_s14 + $0x70] sm:$0xff] }
  0x1a   : > { %1805 = vst.msk [vmem:[%s2341_s17 + $0x110] sm:$0xff] %vm180_vm0, %v241_v13  ;;  %189 = vst.msk [vmem:[%s2341_s17 + $0x40] sm:$0xff] %vm180_vm0, %v156_v20  ;;  %v163_v37 = vld [vmem:[%s2336_s14 + $0x78] sm:$0xff]  ;;  %v164_v38 = vld [vmem:[%s2336_s14 + $0x80] sm:$0xff]  ;;  %v247_v39 = vmax.f32 %v219_v26, %v158_v24  ;;  %v248_v40 = vmax.f32 %v220_v28, %v159_v27  ;;  %v249_v41 = vmax.f32 %v221_v30, %v160_v29 }
  0x1b   : > { %190 = vst.msk [vmem:[%s2341_s17 + $0x48] sm:$0xff] %vm180_vm0, %v157_v22  ;;  %191 = vst.msk [vmem:[%s2341_s17 + $0x50] sm:$0xff] %vm180_vm0, %v158_v24  ;;  %v223_v42 = vmax.f32 %v158_v24, %v160_v29  ;;  %v165_v43 = vld [vmem:[%s2336_s14 + $0x88] sm:$0xff]  ;;  %v166_v44 = vld [vmem:[%s2336_s14 + $0x90] sm:$0xff]  ;;  %v250_v46 = vmax.f32 %v222_v35, %v161_v31  ;;  %v224_v47 = vmax.f32 %v159_v27, %v161_v31 }
  0x1c   : > { %1806 = vst.msk [vmem:[%s2341_s17 + $0x118] sm:$0xff] %vm180_vm0, %v242_v18  ;;  %192 = vst.msk [vmem:[%s2341_s17 + $0x58] sm:$0xff] %vm180_vm0, %v159_v27  ;;  %v2439_v45 = vld [vmem:[%s2336_s14 + $0x98] sm:$0xff]  ;;  %v225_v48 = vmax.f32 %v160_v29, %v162_v36  ;;  %v226_v49 = vmax.f32 %v161_v31, %v163_v37  ;;  %v168_v50 = vld [vmem:[%s2336_s14 + $0xa0] sm:$0xff]  ;;  %v227_v54 = vmax.f32 %v162_v36, %v164_v38 }
  0x1d   : > { %193 = vst.msk [vmem:[%s2341_s17 + $0x60] sm:$0xff] %vm180_vm0, %v160_v29  ;;  %194 = vst.msk [vmem:[%s2341_s17 + $0x68] sm:$0xff] %vm180_vm0, %v161_v31  ;;  %v169_v51 = vld [vmem:[%s2336_s14 + $0xa8] sm:$0xff]  ;;  %v170_v52 = vld [vmem:[%s2336_s14 + $0xb0] sm:$0xff]  ;;  %v251_v53 = vmax.f32 %v223_v42, %v162_v36  ;;  %v228_v55 = vmax.f32 %v163_v37, %v165_v43  ;;  %v229_v56 = vmax.f32 %v164_v38, %v166_v44 }
  0x1e   : > { %1807 = vst.msk [vmem:[%s2341_s17 + $0x120] sm:$0xff] %vm180_vm0, %v243_v25  ;;  %195 = vst.msk [vmem:[%s2341_s17 + $0x70] sm:$0xff] %vm180_vm0, %v162_v36  ;;  %v171_v57 = vld [vmem:[%s2336_s14 + $0xb8] sm:$0xff]  ;;  %v172_v58 = vld [vmem:[%s2336_s14 + $0xc0] sm:$0xff]  ;;  %v252_v60 = vmax.f32 %v224_v47, %v163_v37  ;;  %v253_v61 = vmax.f32 %v225_v48, %v164_v38  ;;  %v254_v62 = vmax.f32 %v226_v49, %v165_v43 }
  0x1f   : > { %196 = vst.msk [vmem:[%s2341_s17 + $0x78] sm:$0xff] %vm180_vm0, %v163_v37  ;;  %197 = vst.msk [vmem:[%s2341_s17 + $0x80] sm:$0xff] %vm180_vm0, %v164_v38  ;;  %v173_v59 = vld [vmem:[%s2336_s14 + $0xc8] sm:$0xff]  ;;  %v230_v63 = vmax.f32 %v165_v43, %v2439_v45  ;;  %v174_v0 = vld [vmem:[%s2336_s14 + $0xd0] sm:$0xff]  ;;  %v255_v2 = vmax.f32 %v227_v54, %v166_v44  ;;  %v256_v3 = vmax.f32 %v228_v55, %v2439_v45 }
  0x20   : > { %1808 = vst.msk [vmem:[%s2341_s17 + $0x128] sm:$0xff] %vm180_vm0, %v244_v32  ;;  %1809 = vst.msk [vmem:[%s2341_s17 + $0x130] sm:$0xff] %vm180_vm0, %v245_v33  ;;  %v175_v1 = vld [vmem:[%s2336_s14 + $0xd8] sm:$0xff]  ;;  %v257_v4 = vmax.f32 %v229_v56, %v168_v50  ;;  %v231_v7 = vmax.f32 %v166_v44, %v168_v50  ;;  %v232_v11 = vmax.f32 %v2439_v45, %v169_v51  ;;  %v1837_v18 = vld [vmem:[%s2341_s17 + $0x100] sm:$0xff] }
  0x21   : > { %1810 = vst.msk [vmem:[%s2341_s17 + $0x138] sm:$0xff] %vm180_vm0, %v246_v34  ;;  %198 = vst.msk [vmem:[%s2341_s17 + $0x88] sm:$0xff] %vm180_vm0, %v165_v43  ;;  %v258_v8 = vmax.f32 %v230_v63, %v169_v51  ;;  %v233_v12 = vmax.f32 %v168_v50, %v170_v52  ;;  %v234_v13 = vmax.f32 %v169_v51, %v171_v57  ;;  %v1838_v23 = vld [vmem:[%s2341_s17 + $0x108] sm:$0xff]  ;;  %v2508_v24 = vld [vmem:[%s2341_s17 + $0x110] sm:$0xff]  ;;  %v371_v32 = vrot.slane %v1837_v18, 1 }
  0x22   : > { %199 = vst.msk [vmem:[%s2341_s17 + $0x90] sm:$0xff] %vm180_vm0, %v166_v44  ;;  %200 = vst.msk [vmem:[%s2341_s17 + $0x98] sm:$0xff] %vm180_vm0, %v2439_v45  ;;  %v259_v14 = vmax.f32 %v231_v7, %v170_v52  ;;  %v235_v15 = vmax.f32 %v170_v52, %v172_v58  ;;  %v236_v16 = vmax.f32 %v171_v57, %v173_v59  ;;  %v484_v33 = vrot.slane %v1837_v18, 2 }
  0x23   : > { %1811 = vst.msk [vmem:[%s2341_s17 + $0x140] sm:$0xff] %vm180_vm0, %v247_v39  ;;  %1812 = vst.msk [vmem:[%s2341_s17 + $0x148] sm:$0xff] %vm180_vm0, %v248_v40  ;;  %v237_v17 = vmax.f32 %v172_v58, %v174_v0  ;;  %v260_v19 = vmax.f32 %v232_v11, %v171_v57  ;;  %v261_v20 = vmax.f32 %v233_v12, %v172_v58  ;;  %v372_v34 = vrot.slane %v1838_v23, 1 }
  0x24   : > { %1813 = vst.msk [vmem:[%s2341_s17 + $0x150] sm:$0xff] %vm180_vm0, %v249_v41  ;;  %201 = vst.msk [vmem:[%s2341_s17 + $0xa0] sm:$0xff] %vm180_vm0, %v168_v50  ;;  %v262_v21 = vmax.f32 %v234_v13, %v173_v59  ;;  %v238_v22 = vmax.f32 %v173_v59, %v175_v1  ;;  %v263_v25 = vmax.f32 %v235_v15, %v174_v0  ;;  %v485_v35 = vrot.slane %v1838_v23, 2 }
  0x25   : > { %202 = vst.msk [vmem:[%s2341_s17 + $0xa8] sm:$0xff] %vm180_vm0, %v169_v51  ;;  %203 = vst.msk [vmem:[%s2341_s17 + $0xb0] sm:$0xff] %vm180_vm0, %v170_v52  ;;  %v264_v26 = vmax.f32 %v236_v16, %v175_v1  ;;  %v265_v27 = vmax.f32 %v237_v17, %v2354_v5  ;;  %v239_v28 = vmax.f32 %v174_v0, %v2354_v5  ;;  %v2515_v29 = vld [vmem:[%s2341_s17 + $0x120] sm:$0xff]  ;;  %v374_v36 = vrot.slane %v2508_v24, 1  ;;  %v1868_v52 = vld [vmem:[%s2341_s17 + $0x1f8] sm:$0xff] }
  0x26   : > { %1814 = vst.msk [vmem:[%s2341_s17 + $0x158] sm:$0xff] %vm180_vm0, %v250_v46  ;;  %204 = vst.msk [vmem:[%s2341_s17 + $0xb8] sm:$0xff] %vm180_vm0, %v171_v57  ;;  %v266_v30 = vmax.f32 %v238_v22, %v2370_v9  ;;  %v240_v31 = vmax.f32 %v175_v1, %v2370_v9  ;;  %v645_v38 = vmax.f32 %v1837_v18, %v371_v32  ;;  %v2641_v22 = vld [vmem:[%s2341_s17 + $0x1f0] sm:$0xff]  ;;  %v417_v39 = vrot.slane %v1868_v52, 1 }
  0x27   : > { %205 = vst.msk [vmem:[%s2341_s17 + $0xc0] sm:$0xff] %vm180_vm0, %v172_v58  ;;  %206 = vst.msk [vmem:[%s2341_s17 + $0xc8] sm:$0xff] %vm180_vm0, %v173_v59  ;;  %v267_v5 = vmax.f32 %v239_v28, %v2357_v6  ;;  %v2534_v9 = vld [vmem:[%s2341_s17 + $0x130] sm:$0xff]  ;;  %v377_v6 = vrot.slane %v2515_v29, 1  ;;  %v373_v41 = vsel %vm370_vm1, %v371_v32, %v372_v34  ;;  %v452_v42 = vmax.f32 %v1838_v23, %v372_v34  ;;  %v2654_v28 = vld [vmem:[%s2341_s17 + $0x118] sm:$0xff] }
  0x28   : > { %1815 = vst.msk [vmem:[%s2341_s17 + $0x160] sm:$0xff] %vm180_vm0, %v251_v53  ;;  %207 = vst.msk [vmem:[%s2341_s17 + $0xd0] sm:$0xff] %vm180_vm0, %v174_v0  ;;  %v268_v37 = vmax.f32 %v240_v31, %v2373_v10  ;;  %v486_v43 = vsel %vm483_vm2, %v484_v33, %v485_v35  ;;  %v646_v10 = vmax.f32 %v2508_v24, %v374_v36  ;;  %v380_v48 = vrot.slane %v2534_v9, 1  ;;  %v2670_v34 = vld [vmem:[%s2341_s17 + $0x138] sm:$0xff] }
  0x29   : > { %208 = vst.msk [vmem:[%s2341_s17 + $0xd8] sm:$0xff] %vm180_vm0, %v175_v1  ;;  %1816 = vst.msk [vmem:[%s2341_s17 + $0x168] sm:$0xff] %vm180_vm0, %v252_v60  ;;  %v451_v45 = vmax.f32 %v1837_v18, %v373_v41  ;;  %v647_v47 = vmax.f32 %v2515_v29, %v377_v6  ;;  %v565_v51 = vmax.f32 %v452_v42, %v485_v35 }
  0x2a   : > { %1817 = vst.msk [vmem:[%s2341_s17 + $0x170] sm:$0xff] %vm180_vm0, %v253_v61  ;;  %1818 = vst.msk [vmem:[%s2341_s17 + $0x178] sm:$0xff] %vm180_vm0, %v254_v62  ;;  %v2542_v40 = vld [vmem:[%s2341_s17 + $0x140] sm:$0xff]  ;;  %v648_v57 = vmax.f32 %v2534_v9, %v380_v48  ;;  %v2673_v35 = vld [vmem:[%s2341_s17 + $0x148] sm:$0xff] }
  0x2b   : > { %1819 = vst.msk [vmem:[%s2341_s17 + $0x180] sm:$0xff] %vm180_vm0, %v255_v2  ;;  %1820 = vst.msk [vmem:[%s2341_s17 + $0x188] sm:$0xff] %vm180_vm0, %v256_v3  ;;  %v2552_v44 = vld [vmem:[%s2341_s17 + $0x150] sm:$0xff]  ;;  %v383_v53 = vrot.slane %v2542_v40, 1  ;;  %v564_v56 = vmax.f32 %v451_v45, %v486_v43  ;;  %v375_v45 = vrot.slane %v2654_v28, 1 }
  0x2c   : > { %1821 = vst.msk [vmem:[%s2341_s17 + $0x190] sm:$0xff] %vm180_vm0, %v257_v4  ;;  %1822 = vst.msk [vmem:[%s2341_s17 + $0x198] sm:$0xff] %vm180_vm0, %v258_v8  ;;  %v386_v58 = vrot.slane %v2552_v44, 1 }
  0x2d   : > { %1823 = vst.msk [vmem:[%s2341_s17 + $0x1a0] sm:$0xff] %vm180_vm0, %v259_v14  ;;  %1824 = vst.msk [vmem:[%s2341_s17 + $0x1a8] sm:$0xff] %vm180_vm0, %v260_v19  ;;  %v649_v61 = vmax.f32 %v2542_v40, %v383_v53 }
  0x2e   : > { %1825 = vst.msk [vmem:[%s2341_s17 + $0x1b0] sm:$0xff] %vm180_vm0, %v261_v20  ;;  %1826 = vst.msk [vmem:[%s2341_s17 + $0x1b8] sm:$0xff] %vm180_vm0, %v262_v21  ;;  %v650_v3 = vmax.f32 %v2552_v44, %v386_v58 }
  0x2f   : > { %1827 = vst.msk [vmem:[%s2341_s17 + $0x1c0] sm:$0xff] %vm180_vm0, %v263_v25  ;;  %1828 = vst.msk [vmem:[%s2341_s17 + $0x1c8] sm:$0xff] %vm180_vm0, %v264_v26  ;;  %v2564_v49 = vld [vmem:[%s2341_s17 + $0x160] sm:$0xff] }
  0x30   : > { %1829 = vst.msk [vmem:[%s2341_s17 + $0x1d0] sm:$0xff] %vm180_vm0, %v265_v27  ;;  %1830 = vst.msk [vmem:[%s2341_s17 + $0x1d8] sm:$0xff] %vm180_vm0, %v266_v30  ;;  %v389_v62 = vrot.slane %v2564_v49, 1  ;;  %v2657_v30 = vld [vmem:[%s2341_s17 + $0x128] sm:$0xff] }
  0x31   : > { %1831 = vst.msk [vmem:[%s2341_s17 + $0x1e0] sm:$0xff] %vm180_vm0, %v267_v5  ;;  %1832 = vst.msk [vmem:[%s2341_s17 + $0x1e8] sm:$0xff] %vm180_vm0, %v268_v37  ;;  %v2567_v50 = vld [vmem:[%s2341_s17 + $0x170] sm:$0xff] }
  0x32   : > { %1901 = vst.msk [vmem:[%s2341_s17 + $0x100] sm:$0x1] %vm661_vm3, %v645_v38  ;;  %1902 = vst.msk [vmem:[%s2341_s17 + $0x110] sm:$0x1] %vm661_vm3, %v646_v10  ;;  %v2577_v55 = vld [vmem:[%s2341_s17 + $0x180] sm:$0xff]  ;;  %v392_v0 = vrot.slane %v2567_v50, 1  ;;  %v651_v12 = vmax.f32 %v2564_v49, %v389_v62 }
  0x33   : > { %1917 = vst.msk [vmem:[%s2341_s17 + $0x109] sm:$0x40] %vm678_vm4, %v452_v42  ;;  %v2587_v60 = vld [vmem:[%s2341_s17 + $0x190] sm:$0xff]  ;;  %v395_v7 = vrot.slane %v2577_v55, 1  ;;  %v4456_v42 = vrot.slane %v2641_v22, 1 }
  0x34   : > { %1903 = vst.msk [vmem:[%s2341_s17 + $0x120] sm:$0x1] %vm661_vm3, %v647_v47  ;;  %v2598_v1 = vld [vmem:[%s2341_s17 + $0x1a0] sm:$0xff]  ;;  %1904 = vst.msk [vmem:[%s2341_s17 + $0x130] sm:$0x1] %vm661_vm3, %v648_v57  ;;  %v652_v13 = vmax.f32 %v2567_v50, %v392_v0  ;;  %v398_v14 = vrot.slane %v2587_v60, 1 }
  0x35   : > { %1870 = vst.msk [vmem:[%s2341_s17 + $0x109] sm:$0x3f] %vm597_vm5, %v565_v51  ;;  %v2601_v2 = vld [vmem:[%s2341_s17 + $0x1b0] sm:$0xff]  ;;  %v653_v17 = vmax.f32 %v2577_v55, %v395_v7  ;;  %v401_v18 = vrot.slane %v2598_v1, 1  ;;  %v378_v47 = vrot.slane %v2657_v30, 1  ;;  %v381_v57 = vrot.slane %v2670_v34, 1 }
  0x36   : > { %1869 = vst.msk [vmem:[%s2341_s17 + $0x101] sm:$0xff] %vm180_vm0, %v564_v56  ;;  %v2614_v11 = vld [vmem:[%s2341_s17 + $0x1c0] sm:$0xff]  ;;  %v404_v20 = vrot.slane %v2601_v2, 1  ;;  %v654_v23 = vmax.f32 %v2587_v60, %v398_v14  ;;  %v660_v56 = vmax.f32 %v2641_v22, %v4456_v42  ;;  %v2809_v59 = vld [vmem:[%s2341_s17 + $0x1b8] sm:$0xff]  ;;  %v2827_v5 = vld [vmem:[%s2341_s17 + $0x1c8] sm:$0xff] }
  0x37   : > { %1905 = vst.msk [vmem:[%s2341_s17 + $0x140] sm:$0x1] %vm661_vm3, %v649_v61  ;;  %v2627_v16 = vld [vmem:[%s2341_s17 + $0x1d0] sm:$0xff]  ;;  %1906 = vst.msk [vmem:[%s2341_s17 + $0x150] sm:$0x1] %vm661_vm3, %v650_v3  ;;  %v407_v26 = vrot.slane %v2614_v11, 1  ;;  %v655_v31 = vmax.f32 %v2598_v1, %v401_v18 }
  0x38   : > { %4465 = vst [vmem:[#allocation2_spill] sm:$0xff] %v2627_v16  ;;  %v2638_v21 = vld [vmem:[%s2341_s17 + $0x1e0] sm:$0xff]  ;;  %1907 = vst.msk [vmem:[%s2341_s17 + $0x160] sm:$0x1] %vm661_vm3, %v651_v12  ;;  %v656_v32 = vmax.f32 %v2601_v2, %v404_v20  ;;  %v410_v33 = vrot.slane %v2627_v16, 1  ;;  %v384_v61 = vrot.slane %v2673_v35, 1  ;;  %v2711_v12 = vsel %vm370_vm1, %v374_v36, %v375_v45 }
  0x39   : > { %1908 = vst.msk [vmem:[%s2341_s17 + $0x170] sm:$0x1] %vm661_vm3, %v652_v13  ;;  %1909 = vst.msk [vmem:[%s2341_s17 + $0x180] sm:$0x1] %vm661_vm3, %v653_v17  ;;  %v657_v37 = vmax.f32 %v2614_v11, %v407_v26  ;;  %v4457_v38 = vrot.slane %v2638_v21, 1  ;;  %v2704_v3 = vld [vmem:[%s2341_s17 + $0x158] sm:$0xff]  ;;  %v2714_v13 = vmax.f32 %v2654_v28, %v375_v45  ;;  %v2719_v17 = vsel %vm370_vm1, %v377_v6, %v378_v47 }
  0x3a   : > { %1910 = vst.msk [vmem:[%s2341_s17 + $0x190] sm:$0x1] %vm661_vm3, %v654_v23  ;;  %1911 = vst.msk [vmem:[%s2341_s17 + $0x1a0] sm:$0x1] %vm661_vm3, %v655_v31  ;;  %v658_v43 = vmax.f32 %v2627_v16, %v410_v33  ;;  %v2722_v23 = vmax.f32 %v2657_v30, %v378_v47  ;;  %v2725_v31 = vld [vmem:[%s2341_s17 + $0x168] sm:$0xff]  ;;  %v2747_v45 = vmax.f32 %v2670_v34, %v381_v57  ;;  %v2750_v47 = vld [vmem:[%s2341_s17 + $0x198] sm:$0xff] }
  0x3b   : > { %1912 = vst.msk [vmem:[%s2341_s17 + $0x1b0] sm:$0x1] %vm661_vm3, %v656_v32  ;;  %1913 = vst.msk [vmem:[%s2341_s17 + $0x1c0] sm:$0x1] %vm661_vm3, %v657_v37  ;;  %v659_v51 = vmax.f32 %v2638_v21, %v4457_v38  ;;  %v2728_v32 = vld [vmem:[%s2341_s17 + $0x178] sm:$0xff]  ;;  %v2731_v37 = vld [vmem:[%s2341_s17 + $0x188] sm:$0xff] }
  0x3c   : > { %1914 = vst.msk [vmem:[%s2341_s17 + $0x1d0] sm:$0x1] %vm661_vm3, %v658_v43  ;;  %1916 = vst.msk [vmem:[%s2341_s17 + $0x1f0] sm:$0x1] %vm661_vm3, %v660_v56  ;;  %v2744_v43 = vsel %vm370_vm1, %v380_v48, %v381_v57  ;;  %v2766_v48 = vsel %vm370_vm1, %v383_v53, %v384_v61  ;;  %v2769_v57 = vmax.f32 %v2673_v35, %v384_v61  ;;  %v387_v41 = vrot.slane %v2704_v3, 1  ;;  %v2830_v54 = vld [vmem:[%s2341_s17 + $0x1d8] sm:$0xff] }
  0x3d   : > { %1915 = vst.msk [vmem:[%s2341_s17 + $0x1e0] sm:$0x1] %vm661_vm3, %v659_v51  ;;  %v2753_v51 = vld [vmem:[%s2341_s17 + $0x1a8] sm:$0xff]  ;;  %v390_v27 = vrot.slane %v2725_v31, 1  ;;  %v393_v25 = vrot.slane %v2728_v32, 1  ;;  %v396_v53 = vrot.slane %v2731_v37, 1 }
  0x3e   : > { %1918 = vst.msk [vmem:[%s2341_s17 + $0x119] sm:$0x40] %vm678_vm4, %v2714_v13  ;;  %1919 = vst.msk [vmem:[%s2341_s17 + $0x129] sm:$0x40] %vm678_vm4, %v2722_v23  ;;  %v2786_v61 = vsel %vm370_vm1, %v386_v58, %v387_v41  ;;  %v2789_v19 = vmax.f32 %v2704_v3, %v387_v41  ;;  %v399_v15 = vrot.slane %v2750_v47, 1  ;;  %v402_v8 = vrot.slane %v2753_v51, 1 }
  0x3f   : > { %1920 = vst.msk [vmem:[%s2341_s17 + $0x139] sm:$0x40] %vm678_vm4, %v2747_v45  ;;  %1921 = vst.msk [vmem:[%s2341_s17 + $0x149] sm:$0x40] %vm678_vm4, %v2769_v57  ;;  %v2798_v63 = vsel %vm370_vm1, %v389_v62, %v390_v27  ;;  %v2801_v58 = vmax.f32 %v2725_v31, %v390_v27  ;;  %v2806_v41 = vsel %vm370_vm1, %v392_v0, %v393_v25  ;;  %v2833_v56 = vld [vmem:[%s2341_s17 + $0x1e8] sm:$0xff]  ;;  %v408_v6 = vrot.slane %v2827_v5, 1 }
  0x40   : > { %1922 = vst.msk [vmem:[%s2341_s17 + $0x159] sm:$0x40] %vm678_vm4, %v2789_v19  ;;  %v2819_v27 = vmax.f32 %v2728_v32, %v393_v25  ;;  %v2824_v0 = vsel %vm370_vm1, %v395_v7, %v396_v53  ;;  %4466 = vst [vmem:[#allocation3_spill] sm:$0xff] %v2827_v5  ;;  %v2841_v62 = vmax.f32 %v2731_v37, %v396_v53 }
  0x41   : > { %1923 = vst.msk [vmem:[%s2341_s17 + $0x169] sm:$0x40] %vm678_vm4, %v2801_v58  ;;  %v2846_v7 = vsel %vm370_vm1, %v398_v14, %v399_v15  ;;  %v2849_v4 = vmax.f32 %v2750_v47, %v399_v15  ;;  %v2860_v53 = vsel %vm370_vm1, %v401_v18, %v402_v8  ;;  %v2863_v25 = vmax.f32 %v2753_v51, %v402_v8 }
  0x42   : > { %1924 = vst.msk [vmem:[%s2341_s17 + $0x179] sm:$0x40] %vm678_vm4, %v2819_v27  ;;  %v405_v14 = vrot.slane %v2809_v59, 1  ;;  %1925 = vst.msk [vmem:[%s2341_s17 + $0x189] sm:$0x40] %vm678_vm4, %v2841_v62  ;;  %v411_v18 = vrot.slane %v2830_v54, 1  ;;  %v2893_v42 = vsel %vm370_vm1, %v407_v26, %v408_v6  ;;  %v2896_v38 = vmax.f32 %v2827_v5, %v408_v6 }
  0x43   : > { %1926 = vst.msk [vmem:[%s2341_s17 + $0x199] sm:$0x40] %vm678_vm4, %v2849_v4  ;;  %v414_v8 = vrot.slane %v2833_v56, 1  ;;  %1927 = vst.msk [vmem:[%s2341_s17 + $0x1a9] sm:$0x40] %vm678_vm4, %v2863_v25  ;;  %v530_v15 = vrot.slane %v1868_v52, 2 }
  0x44   : > { %v2883_v36 = vsel %vm370_vm1, %v404_v20, %v405_v14  ;;  %v2886_v46 = vmax.f32 %v2809_v59, %v405_v14  ;;  %v2901_v20 = vsel %vm370_vm1, %v410_v33, %v411_v18  ;;  %v2911_v10 = vmax.f32 %v2830_v54, %v411_v18  ;;  %1929 = vst.msk [vmem:[%s2341_s17 + $0x1c9] sm:$0x40] %vm678_vm4, %v2896_v38 }
  0x45   : > { %4467 = vst [vmem:[#allocation4_spill] sm:$0xff] %v2883_v36  ;;  %4468 = vst [vmem:[#allocation5_spill] sm:$0xff] %v2901_v20  ;;  %v4469_v6 = vrot.slane %v2638_v21, 1  ;;  %v2924_v5 = vmax.f32 %v2833_v56, %v414_v8  ;;  %v4471_v14 = vrot.slane %v2641_v22, 1  ;;  %v482_v18 = vmax.f32 %v1868_v52, %v417_v39 }
  0x46   : > { %1928 = vst.msk [vmem:[%s2341_s17 + $0x1b9] sm:$0x40] %vm678_vm4, %v2886_v46  ;;  %1930 = vst.msk [vmem:[%s2341_s17 + $0x1d9] sm:$0x40] %vm678_vm4, %v2911_v10  ;;  %v4472_v20 = vrot.slane %v2641_v22, 2  ;;  %v488_v33 = vrot.slane %v2654_v28, 2 }
  0x47   : > { %v2916_v36 = vsel %vm370_vm1, %v4469_v6, %v414_v8  ;;  %4470 = vst [vmem:[#allocation6_spill] sm:$0xff] %v2924_v5  ;;  %v418_v26 = vsel %vm370_vm1, %v4471_v14, %v417_v39  ;;  %v491_v8 = vrot.slane %v2657_v30, 2  ;;  %1931 = vst.msk [vmem:[%s2341_s17 + $0x1e9] sm:$0x40] %vm678_vm4, %v2924_v5  ;;  %v595_v39 = vmax.f32 %v482_v18, %v530_v15 }
  0x48   : > { %v481_v6 = vmax.f32 %v2641_v22, %v418_v26  ;;  %v531_v16 = vsel %vm483_vm2, %v4472_v20, %v530_v15  ;;  %1932 = vst.msk [vmem:[%s2341_s17 + $0x1f9] sm:$0x40] %vm678_vm4, %v482_v18  ;;  %v494_v52 = vrot.slane %v2670_v34, 2  ;;  %v497_v14 = vrot.slane %v2673_v35, 2 }
  0x49   : > { %v500_v22 = vrot.slane %v2704_v3, 2  ;;  %v4473_v28 = vrot.slane %v2508_v24, 2  ;;  %v567_v26 = vmax.f32 %v2714_v13, %v488_v33  ;;  %v4474_v5 = vrot.slane %v2515_v29, 2  ;;  %1900 = vst.msk [vmem:[%s2341_s17 + $0x1f9] sm:$0x3f] %vm597_vm5, %v595_v39 }
  0x4a   : > { %v594_v20 = vmax.f32 %v481_v6, %v531_v16  ;;  %v4475_v34 = vmax.f32 %v2508_v24, %v2711_v12  ;;  %v4476_v16 = vmax.f32 %v2515_v29, %v2719_v17  ;;  %v569_v18 = vmax.f32 %v2722_v23, %v491_v8 }
  0x4b   : > { %v489_v30 = vsel %vm483_vm2, %v4473_v28, %v488_v33  ;;  %v492_v15 = vsel %vm483_vm2, %v4474_v5, %v491_v8  ;;  %v4477_v6 = vrot.slane %v2534_v9, 2  ;;  %1872 = vst.msk [vmem:[%s2341_s17 + $0x119] sm:$0x3f] %vm597_vm5, %v567_v26  ;;  %v4478_v24 = vmax.f32 %v2534_v9, %v2744_v43 }
  0x4c   : > { %v566_v35 = vmax.f32 %v4475_v34, %v489_v30  ;;  %v568_v3 = vmax.f32 %v4476_v16, %v492_v15  ;;  %1899 = vst.msk [vmem:[%s2341_s17 + $0x1f1] sm:$0xff] %vm180_vm0, %v594_v20  ;;  %v571_v29 = vmax.f32 %v2747_v45, %v494_v52  ;;  %v4479_v12 = vrot.slane %v2542_v40, 2  ;;  %v4494_v16 = vld [vmem:[#allocation3_spill] sm:$0xff] }
  0x4d   : > { %v495_v13 = vsel %vm483_vm2, %v4477_v6, %v494_v52  ;;  %v573_v23 = vmax.f32 %v2769_v57, %v497_v14  ;;  %1874 = vst.msk [vmem:[%s2341_s17 + $0x129] sm:$0x3f] %vm597_vm5, %v569_v18  ;;  %v4480_v9 = vmax.f32 %v2542_v40, %v2766_v48  ;;  %v4481_v45 = vrot.slane %v2552_v44, 2  ;;  %v1933_v18 = vld [vmem:[%s2341_s17 + $0x100] sm:$0xff] }
  0x4e   : > { %v570_v5 = vmax.f32 %v4478_v24, %v495_v13  ;;  %v498_v17 = vsel %vm483_vm2, %v4479_v12, %v497_v14  ;;  %1871 = vst.msk [vmem:[%s2341_s17 + $0x111] sm:$0xff] %vm180_vm0, %v566_v35  ;;  %1873 = vst.msk [vmem:[%s2341_s17 + $0x121] sm:$0xff] %vm180_vm0, %v568_v3  ;;  %v575_v8 = vmax.f32 %v2789_v19, %v500_v22  ;;  %v503_v57 = vrot.slane %v2725_v31, 2 }
  0x4f   : > { %v572_v43 = vmax.f32 %v4480_v9, %v498_v17  ;;  %v501_v33 = vsel %vm483_vm2, %v4481_v45, %v500_v22  ;;  %1876 = vst.msk [vmem:[%s2341_s17 + $0x139] sm:$0x3f] %vm597_vm5, %v571_v29  ;;  %1878 = vst.msk [vmem:[%s2341_s17 + $0x149] sm:$0x3f] %vm597_vm5, %v573_v23  ;;  %v4482_v39 = vmax.f32 %v2552_v44, %v2786_v61  ;;  %v506_v48 = vrot.slane %v2728_v32, 2 }
  0x50   : > { %1875 = vst.msk [vmem:[%s2341_s17 + $0x131] sm:$0xff] %vm180_vm0, %v570_v5  ;;  %v509_v52 = vrot.slane %v2731_v37, 2  ;;  %v512_v14 = vrot.slane %v2750_v47, 2  ;;  %v4483_v19 = vrot.slane %v2564_v49, 2  ;;  %v577_v44 = vmax.f32 %v2801_v58, %v503_v57  ;;  %v1934_v5 = vld [vmem:[%s2341_s17 + $0x108] sm:$0xff] }
  0x51   : > { %v574_v40 = vmax.f32 %v4482_v39, %v501_v33  ;;  %1877 = vst.msk [vmem:[%s2341_s17 + $0x141] sm:$0xff] %vm180_vm0, %v572_v43  ;;  %v515_v61 = vrot.slane %v2753_v51, 2  ;;  %v518_v32 = vrot.slane %v2809_v59, 2  ;;  %v4484_v37 = vmax.f32 %v2564_v49, %v2798_v63 }
  0x52   : > { %1880 = vst.msk [vmem:[%s2341_s17 + $0x159] sm:$0x3f] %vm597_vm5, %v575_v8  ;;  %v504_v31 = vsel %vm483_vm2, %v4483_v19, %v503_v57  ;;  %v4485_v22 = vrot.slane %v2567_v50, 2  ;;  %v579_v28 = vmax.f32 %v2819_v27, %v506_v48  ;;  %v4486_v58 = vrot.slane %v2577_v55, 2  ;;  %1882 = vst.msk [vmem:[%s2341_s17 + $0x169] sm:$0x3f] %vm597_vm5, %v577_v44 }
  0x53   : > { %1879 = vst.msk [vmem:[%s2341_s17 + $0x151] sm:$0xff] %vm180_vm0, %v574_v40  ;;  %v576_v47 = vmax.f32 %v4484_v37, %v504_v31  ;;  %v4487_v59 = vmax.f32 %v2567_v50, %v2806_v41  ;;  %v4488_v63 = vmax.f32 %v2577_v55, %v2824_v0  ;;  %v581_v26 = vmax.f32 %v2841_v62, %v509_v52  ;;  %v4499_v8 = vld [vmem:[#allocation2_spill] sm:$0xff] }
  0x54   : > { %v507_v20 = vsel %vm483_vm2, %v4485_v22, %v506_v48  ;;  %v510_v51 = vsel %vm483_vm2, %v4486_v58, %v509_v52  ;;  %v4489_v15 = vrot.slane %v2587_v60, 2  ;;  %1884 = vst.msk [vmem:[%s2341_s17 + $0x179] sm:$0x3f] %vm597_vm5, %v579_v28  ;;  %v4490_v50 = vmax.f32 %v2587_v60, %v2846_v7 }
  0x55   : > { %v578_v49 = vmax.f32 %v4487_v59, %v507_v20  ;;  %v580_v30 = vmax.f32 %v4488_v63, %v510_v51  ;;  %1881 = vst.msk [vmem:[%s2341_s17 + $0x161] sm:$0xff] %vm180_vm0, %v576_v47  ;;  %v583_v55 = vmax.f32 %v2849_v4, %v512_v14  ;;  %v4491_v0 = vrot.slane %v2598_v1, 2  ;;  %v1935_v24 = vld [vmem:[%s2341_s17 + $0x110] sm:$0xff]  ;;  %v1936_v29 = vld [vmem:[%s2341_s17 + $0x118] sm:$0xff]  ;;  %v1938_v9 = vld [vmem:[%s2341_s17 + $0x128] sm:$0xff] }
  0x56   : > { %v513_v27 = vsel %vm483_vm2, %v4489_v15, %v512_v14  ;;  %v585_v34 = vmax.f32 %v2863_v25, %v515_v61  ;;  %1886 = vst.msk [vmem:[%s2341_s17 + $0x189] sm:$0x3f] %vm597_vm5, %v581_v26  ;;  %v4492_v60 = vmax.f32 %v2598_v1, %v2860_v53  ;;  %v4493_v7 = vrot.slane %v2601_v2, 2  ;;  %v4495_v1 = vld [vmem:[#allocation4_spill] sm:$0xff] }
  0x57   : > { %v582_v41 = vmax.f32 %v4490_v50, %v513_v27  ;;  %v516_v62 = vsel %vm483_vm2, %v4491_v0, %v515_v61  ;;  %1883 = vst.msk [vmem:[%s2341_s17 + $0x171] sm:$0xff] %vm180_vm0, %v578_v49  ;;  %1885 = vst.msk [vmem:[%s2341_s17 + $0x181] sm:$0xff] %vm180_vm0, %v580_v30  ;;  %v587_v25 = vmax.f32 %v2886_v46, %v518_v32  ;;  %v521_v3 = vrot.slane %v4494_v16, 2  ;;  %v1939_v43 = vld [vmem:[%s2341_s17 + $0x130] sm:$0xff]  ;;  %v1940_v52 = vld [vmem:[%s2341_s17 + $0x138] sm:$0xff] }
  0x58   : > { %v584_v4 = vmax.f32 %v4492_v60, %v516_v62  ;;  %v519_v35 = vsel %vm483_vm2, %v4493_v7, %v518_v32  ;;  %1888 = vst.msk [vmem:[%s2341_s17 + $0x199] sm:$0x3f] %vm597_vm5, %v583_v55  ;;  %1890 = vst.msk [vmem:[%s2341_s17 + $0x1a9] sm:$0x3f] %vm597_vm5, %v585_v34  ;;  %v4496_v53 = vmax.f32 %v2601_v2, %v4495_v1  ;;  %v524_v13 = vrot.slane %v2830_v54, 2  ;;  %v1941_v14 = vld [vmem:[%s2341_s17 + $0x140] sm:$0xff] }
  0x59   : > { %1887 = vst.msk [vmem:[%s2341_s17 + $0x191] sm:$0xff] %vm180_vm0, %v582_v41  ;;  %v527_v46 = vrot.slane %v2833_v56, 2  ;;  %v4497_v12 = vrot.slane %v2614_v11, 2  ;;  %v589_v17 = vmax.f32 %v2896_v38, %v521_v3  ;;  %v727_v54 = vmax.f32 %v1933_v18, %v1935_v24  ;;  %v1937_v56 = vld [vmem:[%s2341_s17 + $0x120] sm:$0xff]  ;;  %v1942_v19 = vld [vmem:[%s2341_s17 + $0x148] sm:$0xff] }
  0x5a   : > { %v586_v6 = vmax.f32 %v4496_v53, %v519_v35  ;;  %1889 = vst.msk [vmem:[%s2341_s17 + $0x1a1] sm:$0xff] %vm180_vm0, %v584_v4  ;;  %v728_v23 = vmax.f32 %v1934_v5, %v1936_v29  ;;  %v4498_v45 = vmax.f32 %v2614_v11, %v2893_v42  ;;  %v4500_v57 = vrot.slane %v4499_v8, 2  ;;  %v4502_v11 = vld [vmem:[#allocation5_spill] sm:$0xff]  ;;  %v4505_v61 = vld [vmem:[#allocation6_spill] sm:$0xff]  ;;  %v1943_v47 = vld [vmem:[%s2341_s17 + $0x150] sm:$0xff] }
  0x5b   : > { %1892 = vst.msk [vmem:[%s2341_s17 + $0x1b9] sm:$0x3f] %vm597_vm5, %v587_v25  ;;  %v522_v2 = vsel %vm483_vm2, %v4497_v12, %v521_v3  ;;  %v591_v39 = vmax.f32 %v2911_v10, %v524_v13  ;;  %v4501_v40 = vrot.slane %v2638_v21, 2  ;;  %1894 = vst.msk [vmem:[%s2341_s17 + $0x1c9] sm:$0x3f] %vm597_vm5, %v589_v17  ;;  %v4503_v42 = vmax.f32 %v4499_v8, %v4502_v11  ;;  %v1944_v22 = vld [vmem:[%s2341_s17 + $0x158] sm:$0xff] }
  0x5c   : > { %1891 = vst.msk [vmem:[%s2341_s17 + $0x1b1] sm:$0xff] %vm180_vm0, %v586_v6  ;;  %v588_v33 = vmax.f32 %v4498_v45, %v522_v2  ;;  %v525_v38 = vsel %vm483_vm2, %v4500_v57, %v524_v13  ;;  %v4504_v44 = vmax.f32 %v2638_v21, %v2916_v36  ;;  %v593_v32 = vmax.f32 %v4505_v61, %v527_v46  ;;  %v1945_v49 = vld [vmem:[%s2341_s17 + $0x160] sm:$0xff]  ;;  %v1946_v30 = vld [vmem:[%s2341_s17 + $0x168] sm:$0xff]  ;;  %v1963_v12 = vld [vmem:[%s2341_s17 + $0x1f0] sm:$0xff] }
  0x5d   : > { %v528_v48 = vsel %vm483_vm2, %v4501_v40, %v527_v46  ;;  %v590_v31 = vmax.f32 %v4503_v42, %v525_v38  ;;  %1993 = vst.msk [vmem:[%s2341_s17 + $0x200] sm:$0xff] %vm180_vm0, %v727_v54  ;;  %1994 = vst.msk [vmem:[%s2341_s17 + $0x208] sm:$0xff] %vm180_vm0, %v728_v23  ;;  %v755_v37 = vmax.f32 %v727_v54, %v1937_v56 }
  0x5e   : > { %v592_v10 = vmax.f32 %v4504_v44, %v528_v48  ;;  %1893 = vst.msk [vmem:[%s2341_s17 + $0x1c1] sm:$0xff] %vm180_vm0, %v588_v33  ;;  %v756_v21 = vmax.f32 %v728_v23, %v1938_v9  ;;  %v729_v36 = vmax.f32 %v1935_v24, %v1937_v56  ;;  %v730_v20 = vmax.f32 %v1936_v29, %v1938_v9  ;;  %v1947_v41 = vld [vmem:[%s2341_s17 + $0x170] sm:$0xff]  ;;  %v1948_v55 = vld [vmem:[%s2341_s17 + $0x178] sm:$0xff]  ;;  %v1949_v0 = vld [vmem:[%s2341_s17 + $0x180] sm:$0xff] }
  0x5f   : > { %1896 = vst.msk [vmem:[%s2341_s17 + $0x1d9] sm:$0x3f] %vm597_vm5, %v591_v39  ;;  %v731_v28 = vmax.f32 %v1937_v56, %v1939_v43  ;;  %1898 = vst.msk [vmem:[%s2341_s17 + $0x1e9] sm:$0x3f] %vm597_vm5, %v593_v32  ;;  %v732_v58 = vmax.f32 %v1938_v9, %v1940_v52  ;;  %v733_v51 = vmax.f32 %v1939_v43, %v1941_v14  ;;  %v1950_v7 = vld [vmem:[%s2341_s17 + $0x188] sm:$0xff]  ;;  %v1964_v9 = vld [vmem:[%s2341_s17 + $0x1f8] sm:$0xff] }
  0x60   : > { %1895 = vst.msk [vmem:[%s2341_s17 + $0x1d1] sm:$0xff] %vm180_vm0, %v590_v31  ;;  %1897 = vst.msk [vmem:[%s2341_s17 + $0x1e1] sm:$0xff] %vm180_vm0, %v592_v10  ;;  %v734_v59 = vmax.f32 %v1940_v52, %v1942_v19  ;;  %v735_v63 = vmax.f32 %v1941_v14, %v1943_v47  ;;  %v757_v26 = vmax.f32 %v729_v36, %v1939_v43  ;;  %v1951_v35 = vld [vmem:[%s2341_s17 + $0x190] sm:$0xff]  ;;  %v1952_v25 = vld [vmem:[%s2341_s17 + $0x198] sm:$0xff] }
  0x61   : > { %1965 = vst.msk [vmem:[%s2341_s17 + $0x210] sm:$0xff] %vm180_vm0, %v755_v37  ;;  %1966 = vst.msk [vmem:[%s2341_s17 + $0x218] sm:$0xff] %vm180_vm0, %v756_v21  ;;  %v758_v15 = vmax.f32 %v730_v20, %v1940_v52  ;;  %v759_v27 = vmax.f32 %v731_v28, %v1941_v14  ;;  %v736_v50 = vmax.f32 %v1942_v19, %v1944_v22  ;;  %v1953_v46 = vld [vmem:[%s2341_s17 + $0x1a0] sm:$0xff]  ;;  %v1954_v5 = vld [vmem:[%s2341_s17 + $0x1a8] sm:$0xff] }
  0x62   : > { %v760_v62 = vmax.f32 %v732_v58, %v1942_v19  ;;  %v761_v34 = vmax.f32 %v733_v51, %v1943_v47  ;;  %v762_v60 = vmax.f32 %v734_v59, %v1944_v22  ;;  %v763_v4 = vmax.f32 %v735_v63, %v1945_v49  ;;  %1967 = vst.msk [vmem:[%s2341_s17 + $0x220] sm:$0xff] %vm180_vm0, %v757_v26 }
  0x63   : > { %1968 = vst.msk [vmem:[%s2341_s17 + $0x228] sm:$0xff] %vm180_vm0, %v758_v15  ;;  %1969 = vst.msk [vmem:[%s2341_s17 + $0x230] sm:$0xff] %vm180_vm0, %v759_v27  ;;  %v764_v16 = vmax.f32 %v736_v50, %v1946_v30  ;;  %v737_v3 = vmax.f32 %v1943_v47, %v1945_v49  ;;  %v738_v18 = vmax.f32 %v1944_v22, %v1946_v30  ;;  %v1955_v29 = vld [vmem:[%s2341_s17 + $0x1b0] sm:$0xff]  ;;  %v1956_v56 = vld [vmem:[%s2341_s17 + $0x1b8] sm:$0xff] }
  0x64   : > { %v739_v1 = vmax.f32 %v1945_v49, %v1947_v41  ;;  %1970 = vst.msk [vmem:[%s2341_s17 + $0x238] sm:$0xff] %vm180_vm0, %v760_v62  ;;  %1971 = vst.msk [vmem:[%s2341_s17 + $0x240] sm:$0xff] %vm180_vm0, %v761_v34  ;;  %v740_v53 = vmax.f32 %v1946_v30, %v1948_v55  ;;  %v741_v6 = vmax.f32 %v1947_v41, %v1949_v0  ;;  %v1997_v32 = vld [vmem:[%s2341_s17 + $0x200] sm:$0xff]  ;;  %v1998_v36 = vld [vmem:[%s2341_s17 + $0x208] sm:$0xff] }
  0x65   : > { %1972 = vst.msk [vmem:[%s2341_s17 + $0x248] sm:$0xff] %vm180_vm0, %v762_v60  ;;  %1973 = vst.msk [vmem:[%s2341_s17 + $0x250] sm:$0xff] %vm180_vm0, %v763_v4  ;;  %v742_v13 = vmax.f32 %v1948_v55, %v1950_v7  ;;  %v743_v24 = vmax.f32 %v1949_v0, %v1951_v35  ;;  %v765_v2 = vmax.f32 %v737_v3, %v1947_v41  ;;  %v1957_v57 = vld [vmem:[%s2341_s17 + $0x1c0] sm:$0xff]  ;;  %v1958_v38 = vld [vmem:[%s2341_s17 + $0x1c8] sm:$0xff]  ;;  %v884_v30 = vrot.slane %v1997_v32, 1 }
  0x66   : > { %1974 = vst.msk [vmem:[%s2341_s17 + $0x258] sm:$0xff] %vm180_vm0, %v764_v16  ;;  %v766_v17 = vmax.f32 %v738_v18, %v1948_v55  ;;  %v767_v54 = vmax.f32 %v739_v1, %v1949_v0  ;;  %v744_v23 = vmax.f32 %v1950_v7, %v1952_v25  ;;  %v768_v43 = vmax.f32 %v740_v53, %v1950_v7 }
  0x67   : > { %v769_v45 = vmax.f32 %v741_v6, %v1951_v35  ;;  %v770_v33 = vmax.f32 %v742_v13, %v1952_v25  ;;  %v771_v8 = vmax.f32 %v743_v24, %v1953_v46  ;;  %v1961_v39 = vld [vmem:[%s2341_s17 + $0x1e0] sm:$0xff]  ;;  %v1962_v40 = vld [vmem:[%s2341_s17 + $0x1e8] sm:$0xff]  ;;  %1975 = vst.msk [vmem:[%s2341_s17 + $0x260] sm:$0xff] %vm180_vm0, %v765_v2  ;;  %v745_v52 = vmax.f32 %v1951_v35, %v1953_v46  ;;  %v1959_v11 = vld [vmem:[%s2341_s17 + $0x1d0] sm:$0xff] }
  0x68   : > { %1976 = vst.msk [vmem:[%s2341_s17 + $0x268] sm:$0xff] %vm180_vm0, %v766_v17  ;;  %1977 = vst.msk [vmem:[%s2341_s17 + $0x270] sm:$0xff] %vm180_vm0, %v767_v54  ;;  %v772_v48 = vmax.f32 %v744_v23, %v1954_v5  ;;  %v746_v14 = vmax.f32 %v1952_v25, %v1954_v5  ;;  %v747_v19 = vmax.f32 %v1953_v46, %v1955_v29  ;;  %v1960_v61 = vld [vmem:[%s2341_s17 + $0x1d8] sm:$0xff]  ;;  %v3198_v26 = vld [vmem:[%s2341_s17 + $0x210] sm:$0xff]  ;;  %v996_v50 = vrot.slane %v1997_v32, 2 }
  0x69   : > { %v815_v42 = vmax.f32 %v1961_v39, %v1963_v12  ;;  %v816_v31 = vmax.f32 %v1962_v40, %v1964_v9  ;;  %1978 = vst.msk [vmem:[%s2341_s17 + $0x278] sm:$0xff] %vm180_vm0, %v768_v43  ;;  %1979 = vst.msk [vmem:[%s2341_s17 + $0x280] sm:$0xff] %vm180_vm0, %v769_v45  ;;  %v748_v44 = vmax.f32 %v1954_v5, %v1956_v56  ;;  %v885_v41 = vrot.slane %v1998_v36, 1  ;;  %v3205_v55 = vld [vmem:[%s2341_s17 + $0x220] sm:$0xff] }
  0x6a   : > { %1980 = vst.msk [vmem:[%s2341_s17 + $0x288] sm:$0xff] %vm180_vm0, %v770_v33  ;;  %1981 = vst.msk [vmem:[%s2341_s17 + $0x290] sm:$0xff] %vm180_vm0, %v771_v8  ;;  %v749_v10 = vmax.f32 %v1955_v29, %v1957_v57  ;;  %v773_v37 = vmax.f32 %v745_v52, %v1955_v29  ;;  %v774_v47 = vmax.f32 %v746_v14, %v1956_v56  ;;  %v997_v60 = vrot.slane %v1998_v36, 2  ;;  %v3210_v4 = vld [vmem:[%s2341_s17 + $0x230] sm:$0xff] }
  0x6b   : > { %1982 = vst.msk [vmem:[%s2341_s17 + $0x298] sm:$0xff] %vm180_vm0, %v772_v48  ;;  %v775_v22 = vmax.f32 %v747_v19, %v1957_v57  ;;  %v750_v21 = vmax.f32 %v1956_v56, %v1958_v38  ;;  %1995 = vst.msk [vmem:[%s2341_s17 + $0x2f0] sm:$0xff] %vm180_vm0, %v815_v42  ;;  %v776_v20 = vmax.f32 %v748_v44, %v1958_v38  ;;  %v887_v25 = vrot.slane %v3198_v26, 1  ;;  %v3220_v3 = vld [vmem:[%s2341_s17 + $0x240] sm:$0xff] }
  0x6c   : > { %1996 = vst.msk [vmem:[%s2341_s17 + $0x2f8] sm:$0xff] %vm180_vm0, %v816_v31  ;;  %v777_v28 = vmax.f32 %v749_v10, %v1959_v11  ;;  %v751_v58 = vmax.f32 %v1957_v57, %v1959_v11  ;;  %v752_v51 = vmax.f32 %v1958_v38, %v1960_v61  ;;  %1983 = vst.msk [vmem:[%s2341_s17 + $0x2a0] sm:$0xff] %vm180_vm0, %v773_v37  ;;  %v999_v16 = vrot.slane %v3198_v26, 2  ;;  %v3239_v29 = vld [vmem:[%s2341_s17 + $0x250] sm:$0xff] }
  0x6d   : > { %1984 = vst.msk [vmem:[%s2341_s17 + $0x2a8] sm:$0xff] %vm180_vm0, %v774_v47  ;;  %1985 = vst.msk [vmem:[%s2341_s17 + $0x2b0] sm:$0xff] %vm180_vm0, %v775_v22  ;;  %v778_v59 = vmax.f32 %v750_v21, %v1960_v61  ;;  %v753_v49 = vmax.f32 %v1959_v11, %v1961_v39  ;;  %v754_v63 = vmax.f32 %v1960_v61, %v1962_v40  ;;  %v890_v53 = vrot.slane %v3205_v55, 1 }
  0x6e   : > { %1986 = vst.msk [vmem:[%s2341_s17 + $0x2b8] sm:$0xff] %vm180_vm0, %v776_v20  ;;  %1987 = vst.msk [vmem:[%s2341_s17 + $0x2c0] sm:$0xff] %vm180_vm0, %v777_v28  ;;  %v779_v15 = vmax.f32 %v751_v58, %v1961_v39  ;;  %v780_v27 = vmax.f32 %v752_v51, %v1962_v40  ;;  %v1156_v34 = vmax.f32 %v1997_v32, %v884_v30  ;;  %v893_v24 = vrot.slane %v3210_v4, 1  ;;  %v3253_v8 = vld [vmem:[%s2341_s17 + $0x260] sm:$0xff] }
  0x6f   : > { %1988 = vst.msk [vmem:[%s2341_s17 + $0x2c8] sm:$0xff] %vm180_vm0, %v778_v59  ;;  %v781_v0 = vmax.f32 %v753_v49, %v1963_v12  ;;  %v782_v62 = vmax.f32 %v754_v63, %v1964_v9  ;;  %v886_v7 = vsel %vm370_vm1, %v884_v30, %v885_v41  ;;  %v965_v35 = vmax.f32 %v1998_v36, %v885_v41  ;;  %v3268_v48 = vld [vmem:[%s2341_s17 + $0x270] sm:$0xff] }
  0x70   : > { %1989 = vst.msk [vmem:[%s2341_s17 + $0x2d0] sm:$0xff] %vm180_vm0, %v779_v15  ;;  %1990 = vst.msk [vmem:[%s2341_s17 + $0x2d8] sm:$0xff] %vm180_vm0, %v780_v27  ;;  %v964_v18 = vmax.f32 %v1997_v32, %v886_v7  ;;  %v998_v1 = vsel %vm483_vm2, %v996_v50, %v997_v60  ;;  %v1157_v46 = vmax.f32 %v3198_v26, %v887_v25  ;;  %v896_v23 = vrot.slane %v3220_v3, 1  ;;  %v3271_v52 = vld [vmem:[%s2341_s17 + $0x280] sm:$0xff]  ;;  %v3337_v7 = vld [vmem:[%s2341_s17 + $0x218] sm:$0xff] }
  0x71   : > { %1991 = vst.msk [vmem:[%s2341_s17 + $0x2e0] sm:$0xff] %vm180_vm0, %v781_v0  ;;  %1992 = vst.msk [vmem:[%s2341_s17 + $0x2e8] sm:$0xff] %vm180_vm0, %v782_v62  ;;  %v1077_v13 = vmax.f32 %v965_v35, %v997_v60  ;;  %v1158_v54 = vmax.f32 %v3205_v55, %v890_v53  ;;  %v1159_v57 = vmax.f32 %v3210_v4, %v893_v24  ;;  %v899_v39 = vrot.slane %v3239_v29, 1  ;;  %v3276_v31 = vld [vmem:[%s2341_s17 + $0x290] sm:$0xff] }
  0x72   : > { %2061 = vst.msk [vmem:[%s2341_s17 + $0x200] sm:$0x1] %vm661_vm3, %v1156_v34  ;;  %v2027_v12 = vld [vmem:[%s2341_s17 + $0x2f0] sm:$0xff]  ;;  %v1076_v17 = vmax.f32 %v964_v18, %v998_v1  ;;  %2062 = vst.msk [vmem:[%s2341_s17 + $0x210] sm:$0x1] %vm661_vm3, %v1157_v46  ;;  %v1160_v38 = vmax.f32 %v3220_v3, %v896_v23  ;;  %v902_v61 = vrot.slane %v3253_v8, 1 }
  0x73   : > { %2077 = vst.msk [vmem:[%s2341_s17 + $0x209] sm:$0x40] %vm678_vm4, %v965_v35  ;;  %v2028_v2 = vld [vmem:[%s2341_s17 + $0x2f8] sm:$0xff]  ;;  %v929_v9 = vrot.slane %v2027_v12, 1  ;;  %v1041_v43 = vrot.slane %v2027_v12, 2  ;;  %v1161_v10 = vmax.f32 %v3239_v29, %v899_v39  ;;  %v3288_v37 = vld [vmem:[%s2341_s17 + $0x2a0] sm:$0xff] }
  0x74   : > { %v930_v45 = vrot.slane %v2028_v2, 1  ;;  %2030 = vst.msk [vmem:[%s2341_s17 + $0x209] sm:$0x3f] %vm597_vm5, %v1077_v13  ;;  %v1042_v33 = vrot.slane %v2028_v2, 2  ;;  %v905_v22 = vrot.slane %v3268_v48, 1  ;;  %v908_v36 = vrot.slane %v3271_v52, 1 }
  0x75   : > { %2029 = vst.msk [vmem:[%s2341_s17 + $0x201] sm:$0xff] %vm180_vm0, %v1076_v17  ;;  %v1171_v14 = vmax.f32 %v2027_v12, %v929_v9  ;;  %v3298_v20 = vld [vmem:[%s2341_s17 + $0x2b0] sm:$0xff]  ;;  %v1162_v58 = vmax.f32 %v3253_v8, %v902_v61  ;;  %v911_v59 = vrot.slane %v3276_v31, 1  ;;  %v3308_v49 = vld [vmem:[%s2341_s17 + $0x2c0] sm:$0xff]  ;;  %v914_v50 = vrot.slane %v3288_v37, 1  ;;  %v3340_v35 = vld [vmem:[%s2341_s17 + $0x228] sm:$0xff] }
  0x76   : > { %2063 = vst.msk [vmem:[%s2341_s17 + $0x220] sm:$0x1] %vm661_vm3, %v1158_v54  ;;  %v931_v19 = vsel %vm370_vm1, %v929_v9, %v930_v45  ;;  %v995_v11 = vmax.f32 %v2028_v2, %v930_v45  ;;  %v1043_v42 = vsel %vm483_vm2, %v1041_v43, %v1042_v33  ;;  %2064 = vst.msk [vmem:[%s2341_s17 + $0x230] sm:$0x1] %vm661_vm3, %v1159_v57  ;;  %v917_v34 = vrot.slane %v3298_v20, 1  ;;  %v3356_v2 = vld [vmem:[%s2341_s17 + $0x248] sm:$0xff] }
  0x77   : > { %v994_v44 = vmax.f32 %v2027_v12, %v931_v19  ;;  %2065 = vst.msk [vmem:[%s2341_s17 + $0x240] sm:$0x1] %vm661_vm3, %v1160_v38  ;;  %2076 = vst.msk [vmem:[%s2341_s17 + $0x2f0] sm:$0x1] %vm661_vm3, %v1171_v14  ;;  %v3311_v63 = vld [vmem:[%s2341_s17 + $0x2d0] sm:$0xff]  ;;  %v1163_v30 = vmax.f32 %v3268_v48, %v905_v22  ;;  %v1164_v15 = vmax.f32 %v3271_v52, %v908_v36  ;;  %v920_v1 = vrot.slane %v3308_v49, 1 }
  0x78   : > { %2092 = vst.msk [vmem:[%s2341_s17 + $0x2f9] sm:$0x40] %vm678_vm4, %v995_v11  ;;  %v1107_v47 = vmax.f32 %v995_v11, %v1042_v33  ;;  %v3324_v41 = vld [vmem:[%s2341_s17 + $0x2e0] sm:$0xff]  ;;  %v1165_v0 = vmax.f32 %v3276_v31, %v911_v59  ;;  %v1166_v18 = vmax.f32 %v3288_v37, %v914_v50  ;;  %v923_v46 = vrot.slane %v3311_v63, 1  ;;  %v3353_v12 = vld [vmem:[%s2341_s17 + $0x238] sm:$0xff]  ;;  %v3461_v45 = vld [vmem:[%s2341_s17 + $0x2c8] sm:$0xff] }
  0x79   : > { %v1106_v28 = vmax.f32 %v994_v44, %v1043_v42  ;;  %2066 = vst.msk [vmem:[%s2341_s17 + $0x250] sm:$0x1] %vm661_vm3, %v1161_v10  ;;  %2067 = vst.msk [vmem:[%s2341_s17 + $0x260] sm:$0x1] %vm661_vm3, %v1162_v58  ;;  %v3359_v17 = vld [vmem:[%s2341_s17 + $0x258] sm:$0xff]  ;;  %v1167_v54 = vmax.f32 %v3298_v20, %v917_v34  ;;  %v926_v43 = vrot.slane %v3324_v41, 1  ;;  %v1168_v33 = vmax.f32 %v3308_v49, %v920_v1 }
  0x7a   : > { %2060 = vst.msk [vmem:[%s2341_s17 + $0x2f9] sm:$0x3f] %vm597_vm5, %v1107_v47  ;;  %v1169_v57 = vmax.f32 %v3311_v63, %v923_v46  ;;  %v888_v38 = vrot.slane %v3337_v7, 1  ;;  %v891_v14 = vrot.slane %v3340_v35, 1  ;;  %v894_v11 = vrot.slane %v3353_v12, 1  ;;  %v3544_v56 = vld [vmem:[%s2341_s17 + $0x2e8] sm:$0xff] }
  0x7b   : > { %2059 = vst.msk [vmem:[%s2341_s17 + $0x2f1] sm:$0xff] %vm180_vm0, %v1106_v28  ;;  %v1170_v19 = vmax.f32 %v3324_v41, %v926_v43  ;;  %v897_v42 = vrot.slane %v3356_v2, 1  ;;  %v900_v44 = vrot.slane %v3359_v17, 1  ;;  %v921_v32 = vrot.slane %v3461_v45, 1 }
  0x7c   : > { %2068 = vst.msk [vmem:[%s2341_s17 + $0x270] sm:$0x1] %vm661_vm3, %v1163_v30  ;;  %2069 = vst.msk [vmem:[%s2341_s17 + $0x280] sm:$0x1] %vm661_vm3, %v1164_v15  ;;  %v3394_v10 = vsel %vm370_vm1, %v887_v25, %v888_v38  ;;  %v3397_v47 = vmax.f32 %v3337_v7, %v888_v38  ;;  %v3402_v28 = vsel %vm370_vm1, %v890_v53, %v891_v14  ;;  %v3408_v30 = vld [vmem:[%s2341_s17 + $0x268] sm:$0xff]  ;;  %v3411_v15 = vld [vmem:[%s2341_s17 + $0x278] sm:$0xff] }
  0x7d   : > { %2070 = vst.msk [vmem:[%s2341_s17 + $0x290] sm:$0x1] %vm661_vm3, %v1165_v0  ;;  %2071 = vst.msk [vmem:[%s2341_s17 + $0x2a0] sm:$0x1] %vm661_vm3, %v1166_v18  ;;  %v3405_v58 = vmax.f32 %v3340_v35, %v891_v14  ;;  %v966_v25 = vmax.f32 %v3198_v26, %v3394_v10  ;;  %v3422_v53 = vsel %vm370_vm1, %v893_v24, %v894_v11  ;;  %v906_v13 = vrot.slane %v3411_v15, 1 }
  0x7e   : > { %2072 = vst.msk [vmem:[%s2341_s17 + $0x2b0] sm:$0x1] %vm661_vm3, %v1167_v54  ;;  %2073 = vst.msk [vmem:[%s2341_s17 + $0x2c0] sm:$0x1] %vm661_vm3, %v1168_v33  ;;  %v3425_v18 = vmax.f32 %v3353_v12, %v894_v11  ;;  %v3428_v54 = vld [vmem:[%s2341_s17 + $0x288] sm:$0xff]  ;;  %v3431_v33 = vld [vmem:[%s2341_s17 + $0x298] sm:$0xff]  ;;  %v3447_v38 = vsel %vm370_vm1, %v896_v23, %v897_v42  ;;  %v3450_v14 = vmax.f32 %v3356_v2, %v897_v42 }
  0x7f   : > { %2074 = vst.msk [vmem:[%s2341_s17 + $0x2d0] sm:$0x1] %vm661_vm3, %v1169_v57  ;;  %2075 = vst.msk [vmem:[%s2341_s17 + $0x2e0] sm:$0x1] %vm661_vm3, %v1170_v19  ;;  %v3434_v57 = vld [vmem:[%s2341_s17 + $0x2a8] sm:$0xff]  ;;  %v3455_v19 = vsel %vm370_vm1, %v899_v39, %v900_v44  ;;  %v3458_v11 = vld [vmem:[%s2341_s17 + $0x2b8] sm:$0xff]  ;;  %v3471_v42 = vmax.f32 %v3359_v17, %v900_v44  ;;  %v3499_v9 = vsel %vm370_vm1, %v905_v22, %v906_v13 }
  0x80   : > { %2078 = vst.msk [vmem:[%s2341_s17 + $0x219] sm:$0x40] %vm678_vm4, %v3397_v47  ;;  %2079 = vst.msk [vmem:[%s2341_s17 + $0x229] sm:$0x40] %vm678_vm4, %v3405_v58  ;;  %v903_v39 = vrot.slane %v3408_v30, 1  ;;  %v909_v60 = vrot.slane %v3428_v54, 1 }
  0x81   : > { %2080 = vst.msk [vmem:[%s2341_s17 + $0x239] sm:$0x40] %vm678_vm4, %v3425_v18  ;;  %2081 = vst.msk [vmem:[%s2341_s17 + $0x249] sm:$0x40] %vm678_vm4, %v3450_v14  ;;  %v912_v62 = vrot.slane %v3431_v33, 1  ;;  %v915_v27 = vrot.slane %v3434_v57, 1 }
  0x82   : > { %2082 = vst.msk [vmem:[%s2341_s17 + $0x259] sm:$0x40] %vm678_vm4, %v3471_v42  ;;  %v3487_v44 = vsel %vm370_vm1, %v902_v61, %v903_v39  ;;  %v3490_v51 = vmax.f32 %v3408_v30, %v903_v39  ;;  %v918_v21 = vrot.slane %v3458_v11, 1  ;;  %v3502_v61 = vmax.f32 %v3411_v15, %v906_v13 }
  0x83   : > { %v3507_v39 = vsel %vm370_vm1, %v908_v36, %v909_v60  ;;  %v3517_v22 = vmax.f32 %v3428_v54, %v909_v60  ;;  %v3522_v13 = vsel %vm370_vm1, %v911_v59, %v912_v62  ;;  %v3525_v36 = vld [vmem:[%s2341_s17 + $0x2d8] sm:$0xff]  ;;  %v3533_v40 = vmax.f32 %v3431_v33, %v912_v62 }
  0x84   : > { %2083 = vst.msk [vmem:[%s2341_s17 + $0x269] sm:$0x40] %vm678_vm4, %v3490_v51  ;;  %2084 = vst.msk [vmem:[%s2341_s17 + $0x279] sm:$0x40] %vm678_vm4, %v3502_v61  ;;  %v3538_v60 = vsel %vm370_vm1, %v914_v50, %v915_v27  ;;  %v3541_v59 = vmax.f32 %v3434_v57, %v915_v27  ;;  %v3554_v62 = vsel %vm370_vm1, %v917_v34, %v918_v21  ;;  %v924_v24 = vrot.slane %v3525_v36, 1 }
  0x85   : > { %2085 = vst.msk [vmem:[%s2341_s17 + $0x289] sm:$0x40] %vm678_vm4, %v3517_v22  ;;  %v3557_v50 = vmax.f32 %v3458_v11, %v918_v21  ;;  %v3562_v27 = vsel %vm370_vm1, %v920_v1, %v921_v32  ;;  %2086 = vst.msk [vmem:[%s2341_s17 + $0x299] sm:$0x40] %vm678_vm4, %v3533_v40  ;;  %v3575_v21 = vmax.f32 %v3461_v45, %v921_v32  ;;  %v927_v1 = vrot.slane %v3544_v56, 1 }
  0x86   : > { %2087 = vst.msk [vmem:[%s2341_s17 + $0x2a9] sm:$0x40] %vm678_vm4, %v3541_v59  ;;  %v1000_v5 = vrot.slane %v3337_v7, 2  ;;  %v1003_v0 = vrot.slane %v3340_v35, 2  ;;  %v1006_v23 = vrot.slane %v3353_v12, 2  ;;  %v3591_v32 = vsel %vm370_vm1, %v923_v46, %v924_v24 }
  0x87   : > { %2088 = vst.msk [vmem:[%s2341_s17 + $0x2b9] sm:$0x40] %vm678_vm4, %v3557_v50  ;;  %2089 = vst.msk [vmem:[%s2341_s17 + $0x2c9] sm:$0x40] %vm678_vm4, %v3575_v21  ;;  %v3594_v34 = vmax.f32 %v3525_v36, %v924_v24  ;;  %v1009_v6 = vrot.slane %v3356_v2, 2  ;;  %v1012_v7 = vrot.slane %v3359_v17, 2  ;;  %v3603_v12 = vsel %vm370_vm1, %v926_v43, %v927_v1 }
  0x88   : > { %4506 = vst [vmem:[#allocation3_spill] sm:$0xff] %v3591_v32  ;;  %v3606_v46 = vmax.f32 %v3544_v56, %v927_v1  ;;  %v1001_v24 = vsel %vm483_vm2, %v999_v16, %v1000_v5  ;;  %v1079_v43 = vmax.f32 %v3397_v47, %v1000_v5  ;;  %v4507_v1 = vrot.slane %v3205_v55, 2 }
  0x89   : > { %2090 = vst.msk [vmem:[%s2341_s17 + $0x2d9] sm:$0x40] %vm678_vm4, %v3594_v34  ;;  %v1078_v17 = vmax.f32 %v966_v25, %v1001_v24  ;;  %v4508_v16 = vmax.f32 %v3205_v55, %v3402_v28  ;;  %v1081_v2 = vmax.f32 %v3405_v58, %v1003_v0  ;;  %v4509_v26 = vrot.slane %v3210_v4, 2 }
  0x8a   : > { %v1004_v35 = vsel %vm483_vm2, %v4507_v1, %v1003_v0  ;;  %2091 = vst.msk [vmem:[%s2341_s17 + $0x2e9] sm:$0x40] %vm678_vm4, %v3606_v46  ;;  %v1083_v5 = vmax.f32 %v3425_v18, %v1006_v23  ;;  %v4510_v47 = vmax.f32 %v3210_v4, %v3422_v53  ;;  %v4511_v55 = vrot.slane %v3220_v3, 2 }
  0x8b   : > { %v1080_v32 = vmax.f32 %v4508_v16, %v1004_v35  ;;  %v1007_v10 = vsel %vm483_vm2, %v4509_v26, %v1006_v23  ;;  %2032 = vst.msk [vmem:[%s2341_s17 + $0x219] sm:$0x3f] %vm597_vm5, %v1079_v43  ;;  %v1085_v58 = vmax.f32 %v3450_v14, %v1009_v6  ;;  %v4512_v0 = vrot.slane %v3239_v29, 2  ;;  %2034 = vst.msk [vmem:[%s2341_s17 + $0x229] sm:$0x3f] %vm597_vm5, %v1081_v2 }
  0x8c   : > { %2031 = vst.msk [vmem:[%s2341_s17 + $0x211] sm:$0xff] %vm180_vm0, %v1078_v17  ;;  %v1082_v25 = vmax.f32 %v4510_v47, %v1007_v10  ;;  %v1010_v28 = vsel %vm483_vm2, %v4511_v55, %v1009_v6  ;;  %v4513_v4 = vmax.f32 %v3220_v3, %v3447_v38  ;;  %v4514_v23 = vmax.f32 %v3239_v29, %v3455_v19  ;;  %v2093_v47 = vld [vmem:[%s2341_s17 + $0x200] sm:$0xff] }
  0x8d   : > { %v1013_v18 = vsel %vm483_vm2, %v4512_v0, %v1012_v7  ;;  %2033 = vst.msk [vmem:[%s2341_s17 + $0x221] sm:$0xff] %vm180_vm0, %v1080_v32  ;;  %v1087_v14 = vmax.f32 %v3471_v42, %v1012_v7  ;;  %v1015_v35 = vrot.slane %v3408_v30, 2  ;;  %v1018_v32 = vrot.slane %v3411_v15, 2 }
  0x8e   : > { %2036 = vst.msk [vmem:[%s2341_s17 + $0x239] sm:$0x3f] %vm597_vm5, %v1083_v5  ;;  %v1084_v53 = vmax.f32 %v4513_v4, %v1010_v28  ;;  %v1086_v6 = vmax.f32 %v4514_v23, %v1013_v18  ;;  %2038 = vst.msk [vmem:[%s2341_s17 + $0x249] sm:$0x3f] %vm597_vm5, %v1085_v58  ;;  %v1021_v24 = vrot.slane %v3428_v54, 2  ;;  %v1024_v3 = vrot.slane %v3431_v33, 2 }
  0x8f   : > { %2035 = vst.msk [vmem:[%s2341_s17 + $0x231] sm:$0xff] %vm180_vm0, %v1082_v25  ;;  %v1027_v38 = vrot.slane %v3434_v57, 2  ;;  %v4515_v29 = vrot.slane %v3253_v8, 2  ;;  %v1089_v15 = vmax.f32 %v3490_v51, %v1015_v35  ;;  %v1030_v54 = vrot.slane %v3458_v11, 2  ;;  %v2094_v18 = vld [vmem:[%s2341_s17 + $0x208] sm:$0xff] }
  0x90   : > { %2037 = vst.msk [vmem:[%s2341_s17 + $0x241] sm:$0xff] %vm180_vm0, %v1084_v53  ;;  %2039 = vst.msk [vmem:[%s2341_s17 + $0x251] sm:$0xff] %vm180_vm0, %v1086_v6  ;;  %v1033_v33 = vrot.slane %v3461_v45, 2  ;;  %v4516_v57 = vmax.f32 %v3253_v8, %v3487_v44  ;;  %v4517_v42 = vrot.slane %v3268_v48, 2  ;;  %v1091_v2 = vmax.f32 %v3502_v61, %v1018_v32 }
  0x91   : > { %2040 = vst.msk [vmem:[%s2341_s17 + $0x259] sm:$0x3f] %vm597_vm5, %v1087_v14  ;;  %v1016_v30 = vsel %vm483_vm2, %v4515_v29, %v1015_v35  ;;  %v4518_v17 = vrot.slane %v3271_v52, 2  ;;  %2042 = vst.msk [vmem:[%s2341_s17 + $0x269] sm:$0x3f] %vm597_vm5, %v1089_v15  ;;  %v4519_v45 = vmax.f32 %v3268_v48, %v3499_v9  ;;  %v4520_v11 = vmax.f32 %v3271_v52, %v3507_v39 }
  0x92   : > { %v1088_v19 = vmax.f32 %v4516_v57, %v1016_v30  ;;  %v1019_v7 = vsel %vm483_vm2, %v4517_v42, %v1018_v32  ;;  %v1093_v43 = vmax.f32 %v3517_v22, %v1021_v24  ;;  %v4521_v1 = vrot.slane %v3276_v31, 2  ;;  %2044 = vst.msk [vmem:[%s2341_s17 + $0x279] sm:$0x3f] %vm597_vm5, %v1091_v2 }
  0x93   : > { %v1022_v51 = vsel %vm483_vm2, %v4518_v17, %v1021_v24  ;;  %v1090_v8 = vmax.f32 %v4519_v45, %v1019_v7  ;;  %v4522_v48 = vmax.f32 %v3276_v31, %v3522_v13  ;;  %v1095_v9 = vmax.f32 %v3533_v40, %v1024_v3  ;;  %v2095_v25 = vld [vmem:[%s2341_s17 + $0x210] sm:$0xff]  ;;  %v2096_v55 = vld [vmem:[%s2341_s17 + $0x218] sm:$0xff] }
  0x94   : > { %v1092_v44 = vmax.f32 %v4520_v11, %v1022_v51  ;;  %v1025_v61 = vsel %vm483_vm2, %v4521_v1, %v1024_v3  ;;  %2041 = vst.msk [vmem:[%s2341_s17 + $0x261] sm:$0xff] %vm180_vm0, %v1088_v19  ;;  %v4523_v39 = vrot.slane %v3288_v37, 2  ;;  %v1097_v16 = vmax.f32 %v3541_v59, %v1027_v38  ;;  %v2097_v4 = vld [vmem:[%s2341_s17 + $0x220] sm:$0xff]  ;;  %v2098_v53 = vld [vmem:[%s2341_s17 + $0x228] sm:$0xff] }
  0x95   : > { %v1094_v52 = vmax.f32 %v4522_v48, %v1025_v61  ;;  %2043 = vst.msk [vmem:[%s2341_s17 + $0x271] sm:$0xff] %vm180_vm0, %v1090_v8  ;;  %v4524_v31 = vmax.f32 %v3288_v37, %v3538_v60  ;;  %v4525_v40 = vrot.slane %v3298_v20, 2  ;;  %v1099_v59 = vmax.f32 %v3557_v50, %v1030_v54  ;;  %v4530_v3 = vld [vmem:[#allocation3_spill] sm:$0xff] }
  0x96   : > { %v1028_v22 = vsel %vm483_vm2, %v4523_v39, %v1027_v38  ;;  %2046 = vst.msk [vmem:[%s2341_s17 + $0x289] sm:$0x3f] %vm597_vm5, %v1093_v43  ;;  %v4526_v10 = vrot.slane %v3308_v49, 2  ;;  %2048 = vst.msk [vmem:[%s2341_s17 + $0x299] sm:$0x3f] %vm597_vm5, %v1095_v9  ;;  %v4527_v37 = vmax.f32 %v3298_v20, %v3554_v62  ;;  %v4528_v50 = vmax.f32 %v3308_v49, %v3562_v27  ;;  %v2099_v27 = vld [vmem:[%s2341_s17 + $0x230] sm:$0xff] }
  0x97   : > { %2045 = vst.msk [vmem:[%s2341_s17 + $0x281] sm:$0xff] %vm180_vm0, %v1092_v44  ;;  %v1096_v13 = vmax.f32 %v4524_v31, %v1028_v22  ;;  %v1031_v26 = vsel %vm483_vm2, %v4525_v40, %v1030_v54  ;;  %2047 = vst.msk [vmem:[%s2341_s17 + $0x291] sm:$0xff] %vm180_vm0, %v1094_v52  ;;  %v1101_v58 = vmax.f32 %v3575_v21, %v1033_v33  ;;  %v1036_v0 = vrot.slane %v3525_v36, 2  ;;  %v2100_v6 = vld [vmem:[%s2341_s17 + $0x238] sm:$0xff]  ;;  %v2101_v35 = vld [vmem:[%s2341_s17 + $0x240] sm:$0xff] }
  0x98   : > { %v1034_v5 = vsel %vm483_vm2, %v4526_v10, %v1033_v33  ;;  %2050 = vst.msk [vmem:[%s2341_s17 + $0x2a9] sm:$0x3f] %vm597_vm5, %v1097_v16  ;;  %v1098_v60 = vmax.f32 %v4527_v37, %v1031_v26  ;;  %2052 = vst.msk [vmem:[%s2341_s17 + $0x2b9] sm:$0x3f] %vm597_vm5, %v1099_v59  ;;  %v1039_v20 = vrot.slane %v3544_v56, 2  ;;  %v1236_v62 = vmax.f32 %v2093_v47, %v2095_v25  ;;  %v2102_v24 = vld [vmem:[%s2341_s17 + $0x248] sm:$0xff] }
  0x99   : > { %v1100_v28 = vmax.f32 %v4528_v50, %v1034_v5  ;;  %2049 = vst.msk [vmem:[%s2341_s17 + $0x2a1] sm:$0xff] %vm180_vm0, %v1096_v13  ;;  %v1237_v49 = vmax.f32 %v2094_v18, %v2096_v55  ;;  %v1238_v21 = vmax.f32 %v2095_v25, %v2097_v4  ;;  %v4529_v36 = vrot.slane %v3311_v63, 2  ;;  %v2103_v33 = vld [vmem:[%s2341_s17 + $0x250] sm:$0xff]  ;;  %v2104_v57 = vld [vmem:[%s2341_s17 + $0x258] sm:$0xff] }
  0x9a   : > { %2051 = vst.msk [vmem:[%s2341_s17 + $0x2b1] sm:$0xff] %vm180_vm0, %v1098_v60  ;;  %v1103_v56 = vmax.f32 %v3594_v34, %v1036_v0  ;;  %v1239_v14 = vmax.f32 %v2096_v55, %v2098_v53  ;;  %v1240_v32 = vmax.f32 %v2097_v4, %v2099_v27  ;;  %v4531_v38 = vmax.f32 %v3311_v63, %v4530_v3 }
  0x9b   : > { %2054 = vst.msk [vmem:[%s2341_s17 + $0x2c9] sm:$0x3f] %vm597_vm5, %v1101_v58  ;;  %v1037_v23 = vsel %vm483_vm2, %v4529_v36, %v1036_v0  ;;  %v4532_v30 = vrot.slane %v3324_v41, 2  ;;  %v1105_v54 = vmax.f32 %v3606_v46, %v1039_v20  ;;  %v1264_v34 = vmax.f32 %v1236_v62, %v2097_v4  ;;  %v2106_v45 = vld [vmem:[%s2341_s17 + $0x268] sm:$0xff] }
  0x9c   : > { %2053 = vst.msk [vmem:[%s2341_s17 + $0x2c1] sm:$0xff] %vm180_vm0, %v1100_v28  ;;  %v1102_v29 = vmax.f32 %v4531_v38, %v1037_v23  ;;  %2153 = vst.msk [vmem:[%s2341_s17 + $0x300] sm:$0xff] %vm180_vm0, %v1236_v62  ;;  %v4533_v63 = vmax.f32 %v3324_v41, %v3603_v12  ;;  %v1265_v46 = vmax.f32 %v1237_v49, %v2098_v53  ;;  %v2105_v12 = vld [vmem:[%s2341_s17 + $0x260] sm:$0xff]  ;;  %v2107_v44 = vld [vmem:[%s2341_s17 + $0x270] sm:$0xff] }
  0x9d   : > { %v1040_v15 = vsel %vm483_vm2, %v4532_v30, %v1039_v20  ;;  %2154 = vst.msk [vmem:[%s2341_s17 + $0x308] sm:$0xff] %vm180_vm0, %v1237_v49  ;;  %v1266_v42 = vmax.f32 %v1238_v21, %v2099_v27  ;;  %v1267_v7 = vmax.f32 %v1239_v14, %v2100_v6  ;;  %2125 = vst.msk [vmem:[%s2341_s17 + $0x310] sm:$0xff] %vm180_vm0, %v1264_v34  ;;  %v2108_v1 = vld [vmem:[%s2341_s17 + $0x278] sm:$0xff]  ;;  %v2123_v62 = vld [vmem:[%s2341_s17 + $0x2f0] sm:$0xff] }
  0x9e   : > { %2056 = vst.msk [vmem:[%s2341_s17 + $0x2d9] sm:$0x3f] %vm597_vm5, %v1103_v56  ;;  %v1104_v19 = vmax.f32 %v4533_v63, %v1040_v15  ;;  %2058 = vst.msk [vmem:[%s2341_s17 + $0x2e9] sm:$0x3f] %vm597_vm5, %v1105_v54  ;;  %v1268_v2 = vmax.f32 %v1240_v32, %v2101_v35  ;;  %v1241_v17 = vmax.f32 %v2098_v53, %v2100_v6  ;;  %v2109_v48 = vld [vmem:[%s2341_s17 + $0x280] sm:$0xff]  ;;  %v2110_v16 = vld [vmem:[%s2341_s17 + $0x288] sm:$0xff] }
  0x9f   : > { %2055 = vst.msk [vmem:[%s2341_s17 + $0x2d1] sm:$0xff] %vm180_vm0, %v1102_v29  ;;  %v1242_v51 = vmax.f32 %v2099_v27, %v2101_v35  ;;  %v1243_v41 = vmax.f32 %v2100_v6, %v2102_v24  ;;  %2126 = vst.msk [vmem:[%s2341_s17 + $0x318] sm:$0xff] %vm180_vm0, %v1265_v46  ;;  %v1244_v8 = vmax.f32 %v2101_v35, %v2103_v33  ;;  %v2111_v31 = vld [vmem:[%s2341_s17 + $0x290] sm:$0xff]  ;;  %v2112_v13 = vld [vmem:[%s2341_s17 + $0x298] sm:$0xff] }
  0xa0   : > { %2057 = vst.msk [vmem:[%s2341_s17 + $0x2e1] sm:$0xff] %vm180_vm0, %v1104_v19  ;;  %2127 = vst.msk [vmem:[%s2341_s17 + $0x320] sm:$0xff] %vm180_vm0, %v1266_v42  ;;  %v1245_v11 = vmax.f32 %v2102_v24, %v2104_v57  ;;  %v1246_v43 = vmax.f32 %v2103_v33, %v2105_v12  ;;  %v1247_v61 = vmax.f32 %v2104_v57, %v2106_v45  ;;  %v2113_v5 = vld [vmem:[%s2341_s17 + $0x2a0] sm:$0xff]  ;;  %v2114_v47 = vld [vmem:[%s2341_s17 + $0x2a8] sm:$0xff] }
  0xa1   : > { %2128 = vst.msk [vmem:[%s2341_s17 + $0x328] sm:$0xff] %vm180_vm0, %v1267_v7  ;;  %2129 = vst.msk [vmem:[%s2341_s17 + $0x330] sm:$0xff] %vm180_vm0, %v1268_v2  ;;  %v1269_v52 = vmax.f32 %v1241_v17, %v2102_v24  ;;  %v1270_v9 = vmax.f32 %v1242_v51, %v2103_v33  ;;  %v1271_v39 = vmax.f32 %v1243_v41, %v2104_v57  ;;  %v2115_v50 = vld [vmem:[%s2341_s17 + $0x2b0] sm:$0xff]  ;;  %v2116_v18 = vld [vmem:[%s2341_s17 + $0x2b8] sm:$0xff] }
  0xa2   : > { %v1248_v22 = vmax.f32 %v2105_v12, %v2107_v44  ;;  %v1272_v40 = vmax.f32 %v1244_v8, %v2105_v12  ;;  %v1273_v26 = vmax.f32 %v1245_v11, %v2106_v45  ;;  %v1274_v59 = vmax.f32 %v1246_v43, %v2107_v44  ;;  %v2124_v23 = vld [vmem:[%s2341_s17 + $0x2f8] sm:$0xff] }
  0xa3   : > { %v1275_v10 = vmax.f32 %v1247_v61, %v2108_v1  ;;  %2130 = vst.msk [vmem:[%s2341_s17 + $0x338] sm:$0xff] %vm180_vm0, %v1269_v52  ;;  %2131 = vst.msk [vmem:[%s2341_s17 + $0x340] sm:$0xff] %vm180_vm0, %v1270_v9  ;;  %v1249_v55 = vmax.f32 %v2106_v45, %v2108_v1  ;;  %v1250_v37 = vmax.f32 %v2107_v44, %v2109_v48  ;;  %v2117_v53 = vld [vmem:[%s2341_s17 + $0x2c0] sm:$0xff]  ;;  %v2118_v20 = vld [vmem:[%s2341_s17 + $0x2c8] sm:$0xff] }
  0xa4   : > { %2132 = vst.msk [vmem:[%s2341_s17 + $0x348] sm:$0xff] %vm180_vm0, %v1271_v39  ;;  %v1276_v25 = vmax.f32 %v1248_v22, %v2109_v48  ;;  %v1251_v60 = vmax.f32 %v2108_v1, %v2110_v16  ;;  %2133 = vst.msk [vmem:[%s2341_s17 + $0x350] sm:$0xff] %vm180_vm0, %v1272_v40  ;;  %v1252_v28 = vmax.f32 %v2109_v48, %v2111_v31  ;;  %v2157_v34 = vld [vmem:[%s2341_s17 + $0x300] sm:$0xff]  ;;  %v2158_v46 = vld [vmem:[%s2341_s17 + $0x308] sm:$0xff] }
  0xa5   : > { %2134 = vst.msk [vmem:[%s2341_s17 + $0x358] sm:$0xff] %vm180_vm0, %v1273_v26  ;;  %2135 = vst.msk [vmem:[%s2341_s17 + $0x360] sm:$0xff] %vm180_vm0, %v1274_v59  ;;  %v1253_v58 = vmax.f32 %v2110_v16, %v2112_v13  ;;  %v1254_v0 = vmax.f32 %v2111_v31, %v2113_v5  ;;  %v1255_v4 = vmax.f32 %v2112_v13, %v2114_v47  ;;  %v3860_v51 = vld [vmem:[%s2341_s17 + $0x310] sm:$0xff]  ;;  %v1393_v8 = vrot.slane %v2157_v34, 1 }
  0xa6   : > { %2136 = vst.msk [vmem:[%s2341_s17 + $0x368] sm:$0xff] %vm180_vm0, %v1275_v10  ;;  %2137 = vst.msk [vmem:[%s2341_s17 + $0x370] sm:$0xff] %vm180_vm0, %v1276_v25  ;;  %v1277_v49 = vmax.f32 %v1249_v55, %v2110_v16  ;;  %v1278_v27 = vmax.f32 %v1250_v37, %v2111_v31  ;;  %v1279_v21 = vmax.f32 %v1251_v60, %v2112_v13  ;;  %v2119_v32 = vld [vmem:[%s2341_s17 + $0x2d0] sm:$0xff]  ;;  %v2120_v24 = vld [vmem:[%s2341_s17 + $0x2d8] sm:$0xff]  ;;  %v1505_v43 = vrot.slane %v2157_v34, 2 }
  0xa7   : > { %v1256_v36 = vmax.f32 %v2113_v5, %v2115_v50  ;;  %v1280_v56 = vmax.f32 %v1252_v28, %v2113_v5  ;;  %v1281_v6 = vmax.f32 %v1253_v58, %v2114_v47  ;;  %v1282_v14 = vmax.f32 %v1254_v0, %v2115_v50  ;;  %v2121_v3 = vld [vmem:[%s2341_s17 + $0x2e0] sm:$0xff]  ;;  %v2122_v38 = vld [vmem:[%s2341_s17 + $0x2e8] sm:$0xff] }
  0xa8   : > { %v1283_v35 = vmax.f32 %v1255_v4, %v2116_v18  ;;  %2138 = vst.msk [vmem:[%s2341_s17 + $0x378] sm:$0xff] %vm180_vm0, %v1277_v49  ;;  %2139 = vst.msk [vmem:[%s2341_s17 + $0x380] sm:$0xff] %vm180_vm0, %v1278_v27  ;;  %v1257_v30 = vmax.f32 %v2114_v47, %v2116_v18  ;;  %v1258_v15 = vmax.f32 %v2115_v50, %v2117_v53  ;;  %v3867_v11 = vld [vmem:[%s2341_s17 + $0x320] sm:$0xff]  ;;  %v1394_v1 = vrot.slane %v2158_v46, 1  ;;  %v3876_v48 = vld [vmem:[%s2341_s17 + $0x330] sm:$0xff] }
  0xa9   : > { %2140 = vst.msk [vmem:[%s2341_s17 + $0x388] sm:$0xff] %vm180_vm0, %v1279_v21  ;;  %v1284_v29 = vmax.f32 %v1256_v36, %v2117_v53  ;;  %v1259_v54 = vmax.f32 %v2116_v18, %v2118_v20  ;;  %v1324_v33 = vmax.f32 %v2121_v3, %v2123_v62  ;;  %v1325_v57 = vmax.f32 %v2122_v38, %v2124_v23 }
  0xaa   : > { %2141 = vst.msk [vmem:[%s2341_s17 + $0x390] sm:$0xff] %vm180_vm0, %v1280_v56  ;;  %2142 = vst.msk [vmem:[%s2341_s17 + $0x398] sm:$0xff] %vm180_vm0, %v1281_v6  ;;  %v1260_v63 = vmax.f32 %v2117_v53, %v2119_v32  ;;  %v1261_v19 = vmax.f32 %v2118_v20, %v2120_v24  ;;  %v1285_v42 = vmax.f32 %v1257_v30, %v2118_v20  ;;  %v1506_v61 = vrot.slane %v2158_v46, 2  ;;  %v3885_v16 = vld [vmem:[%s2341_s17 + $0x340] sm:$0xff] }
  0xab   : > { %2143 = vst.msk [vmem:[%s2341_s17 + $0x3a0] sm:$0xff] %vm180_vm0, %v1282_v14  ;;  %2144 = vst.msk [vmem:[%s2341_s17 + $0x3a8] sm:$0xff] %vm180_vm0, %v1283_v35  ;;  %v1286_v7 = vmax.f32 %v1258_v15, %v2119_v32  ;;  %v1287_v2 = vmax.f32 %v1259_v54, %v2120_v24  ;;  %v1262_v17 = vmax.f32 %v2119_v32, %v2121_v3  ;;  %v1396_v39 = vrot.slane %v3860_v51, 1  ;;  %v3893_v59 = vld [vmem:[%s2341_s17 + $0x350] sm:$0xff] }
  0xac   : > { %2145 = vst.msk [vmem:[%s2341_s17 + $0x3b0] sm:$0xff] %vm180_vm0, %v1284_v29  ;;  %2155 = vst.msk [vmem:[%s2341_s17 + $0x3f0] sm:$0xff] %vm180_vm0, %v1324_v33  ;;  %v1288_v41 = vmax.f32 %v1260_v63, %v2121_v3  ;;  %v1289_v12 = vmax.f32 %v1261_v19, %v2122_v38  ;;  %v1263_v45 = vmax.f32 %v2120_v24, %v2122_v38  ;;  %v1508_v22 = vrot.slane %v3860_v51, 2  ;;  %v3905_v55 = vld [vmem:[%s2341_s17 + $0x360] sm:$0xff] }
  0xad   : > { %2156 = vst.msk [vmem:[%s2341_s17 + $0x3f8] sm:$0xff] %vm180_vm0, %v1325_v57  ;;  %2146 = vst.msk [vmem:[%s2341_s17 + $0x3b8] sm:$0xff] %vm180_vm0, %v1285_v42  ;;  %v1290_v44 = vmax.f32 %v1262_v17, %v2123_v62  ;;  %v1665_v9 = vmax.f32 %v2157_v34, %v1393_v8  ;;  %v1395_v31 = vsel %vm370_vm1, %v1393_v8, %v1394_v1  ;;  %v1399_v26 = vrot.slane %v3867_v11, 1  ;;  %v3922_v53 = vld [vmem:[%s2341_s17 + $0x370] sm:$0xff] }
  0xae   : > { %2147 = vst.msk [vmem:[%s2341_s17 + $0x3c0] sm:$0xff] %vm180_vm0, %v1286_v7  ;;  %2148 = vst.msk [vmem:[%s2341_s17 + $0x3c8] sm:$0xff] %vm180_vm0, %v1287_v2  ;;  %v1291_v52 = vmax.f32 %v1263_v45, %v2124_v23  ;;  %v1474_v13 = vmax.f32 %v2158_v46, %v1394_v1  ;;  %v1507_v40 = vsel %vm483_vm2, %v1505_v43, %v1506_v61  ;;  %v1402_v25 = vrot.slane %v3876_v48, 1 }
  0xaf   : > { %2149 = vst.msk [vmem:[%s2341_s17 + $0x3d0] sm:$0xff] %vm180_vm0, %v1288_v41  ;;  %2150 = vst.msk [vmem:[%s2341_s17 + $0x3d8] sm:$0xff] %vm180_vm0, %v1289_v12  ;;  %v1473_v10 = vmax.f32 %v2157_v34, %v1395_v31  ;;  %v1666_v5 = vmax.f32 %v3860_v51, %v1396_v39  ;;  %v1667_v60 = vmax.f32 %v3867_v11, %v1399_v26  ;;  %v1405_v28 = vrot.slane %v3885_v16, 1  ;;  %v3941_v35 = vld [vmem:[%s2341_s17 + $0x380] sm:$0xff] }
  0xb0   : > { %2151 = vst.msk [vmem:[%s2341_s17 + $0x3e0] sm:$0xff] %vm180_vm0, %v1290_v44  ;;  %2152 = vst.msk [vmem:[%s2341_s17 + $0x3e8] sm:$0xff] %vm180_vm0, %v1291_v52  ;;  %v1586_v37 = vmax.f32 %v1474_v13, %v1506_v61  ;;  %v1668_v0 = vmax.f32 %v3876_v48, %v1402_v25  ;;  %v1408_v4 = vrot.slane %v3893_v59, 1  ;;  %v1411_v21 = vrot.slane %v3905_v55, 1  ;;  %v3997_v52 = vld [vmem:[%s2341_s17 + $0x318] sm:$0xff] }
  0xb1   : > { %2221 = vst.msk [vmem:[%s2341_s17 + $0x300] sm:$0x1] %vm661_vm3, %v1665_v9  ;;  %v1585_v58 = vmax.f32 %v1473_v10, %v1507_v40  ;;  %2222 = vst.msk [vmem:[%s2341_s17 + $0x310] sm:$0x1] %vm661_vm3, %v1666_v5  ;;  %v1669_v49 = vmax.f32 %v3885_v16, %v1405_v28  ;;  %v1414_v3 = vrot.slane %v3922_v53, 1  ;;  %v3954_v29 = vld [vmem:[%s2341_s17 + $0x390] sm:$0xff] }
  0xb2   : > { %2237 = vst.msk [vmem:[%s2341_s17 + $0x309] sm:$0x40] %vm678_vm4, %v1474_v13  ;;  %v1670_v32 = vmax.f32 %v3893_v59, %v1408_v4  ;;  %v1671_v24 = vmax.f32 %v3905_v55, %v1411_v21  ;;  %v3957_v30 = vld [vmem:[%s2341_s17 + $0x3a0] sm:$0xff]  ;;  %v1417_v46 = vrot.slane %v3941_v35, 1  ;;  %v1420_v17 = vrot.slane %v3954_v29, 1  ;;  %v4010_v10 = vld [vmem:[%s2341_s17 + $0x328] sm:$0xff] }
  0xb3   : > { %v2187_v20 = vld [vmem:[%s2341_s17 + $0x3f0] sm:$0xff]  ;;  %2190 = vst.msk [vmem:[%s2341_s17 + $0x309] sm:$0x3f] %vm597_vm5, %v1586_v37  ;;  %v1672_v19 = vmax.f32 %v3922_v53, %v1414_v3  ;;  %v1423_v12 = vrot.slane %v3957_v30, 1  ;;  %v4013_v5 = vld [vmem:[%s2341_s17 + $0x338] sm:$0xff]  ;;  %v4016_v37 = vld [vmem:[%s2341_s17 + $0x348] sm:$0xff] }
  0xb4   : > { %v2188_v62 = vld [vmem:[%s2341_s17 + $0x3f8] sm:$0xff]  ;;  %2223 = vst.msk [vmem:[%s2341_s17 + $0x320] sm:$0x1] %vm661_vm3, %v1667_v60  ;;  %v1438_v23 = vrot.slane %v2187_v20, 1  ;;  %v1550_v56 = vrot.slane %v2187_v20, 2  ;;  %v3962_v57 = vld [vmem:[%s2341_s17 + $0x3b0] sm:$0xff]  ;;  %v1673_v44 = vmax.f32 %v3941_v35, %v1417_v46  ;;  %v1674_v9 = vmax.f32 %v3954_v29, %v1420_v17 }
  0xb5   : > { %v1439_v6 = vrot.slane %v2188_v62, 1  ;;  %2189 = vst.msk [vmem:[%s2341_s17 + $0x301] sm:$0xff] %vm180_vm0, %v1585_v58  ;;  %v1551_v14 = vrot.slane %v2188_v62, 2  ;;  %v3974_v7 = vld [vmem:[%s2341_s17 + $0x3c0] sm:$0xff]  ;;  %v1426_v1 = vrot.slane %v3962_v57, 1  ;;  %v1675_v31 = vmax.f32 %v3957_v30, %v1423_v12 }
  0xb6   : > { %2224 = vst.msk [vmem:[%s2341_s17 + $0x330] sm:$0x1] %vm661_vm3, %v1668_v0  ;;  %2225 = vst.msk [vmem:[%s2341_s17 + $0x340] sm:$0x1] %vm661_vm3, %v1669_v49  ;;  %v1680_v15 = vmax.f32 %v2187_v20, %v1438_v23  ;;  %v3984_v45 = vld [vmem:[%s2341_s17 + $0x3d0] sm:$0xff]  ;;  %v1429_v40 = vrot.slane %v3974_v7, 1 }
  0xb7   : > { %v1440_v54 = vsel %vm370_vm1, %v1438_v23, %v1439_v6  ;;  %v1504_v34 = vmax.f32 %v2188_v62, %v1439_v6  ;;  %v1552_v33 = vsel %vm483_vm2, %v1550_v56, %v1551_v14  ;;  %2226 = vst.msk [vmem:[%s2341_s17 + $0x350] sm:$0x1] %vm661_vm3, %v1670_v32  ;;  %2227 = vst.msk [vmem:[%s2341_s17 + $0x360] sm:$0x1] %vm661_vm3, %v1671_v24  ;;  %v3994_v61 = vld [vmem:[%s2341_s17 + $0x3e0] sm:$0xff]  ;;  %v1432_v0 = vrot.slane %v3984_v45, 1 }
  0xb8   : > { %v1503_v63 = vmax.f32 %v2187_v20, %v1440_v54  ;;  %2236 = vst.msk [vmem:[%s2341_s17 + $0x3f0] sm:$0x1] %vm661_vm3, %v1680_v15  ;;  %2228 = vst.msk [vmem:[%s2341_s17 + $0x370] sm:$0x1] %vm661_vm3, %v1672_v19  ;;  %v1676_v60 = vmax.f32 %v3962_v57, %v1426_v1  ;;  %v4029_v62 = vld [vmem:[%s2341_s17 + $0x358] sm:$0xff]  ;;  %v1677_v49 = vmax.f32 %v3974_v7, %v1429_v40  ;;  %v1435_v23 = vrot.slane %v3994_v61, 1 }
  0xb9   : > { %2252 = vst.msk [vmem:[%s2341_s17 + $0x3f9] sm:$0x40] %vm678_vm4, %v1504_v34  ;;  %v1616_v2 = vmax.f32 %v1504_v34, %v1551_v14  ;;  %v1397_v6 = vrot.slane %v3997_v52, 1  ;;  %v1678_v14 = vmax.f32 %v3984_v45, %v1432_v0  ;;  %v1400_v32 = vrot.slane %v4010_v10, 1  ;;  %v4064_v19 = vld [vmem:[%s2341_s17 + $0x368] sm:$0xff]  ;;  %v4202_v18 = vld [vmem:[%s2341_s17 + $0x3d8] sm:$0xff] }
  0xba   : > { %v1615_v8 = vmax.f32 %v1503_v63, %v1552_v33  ;;  %2229 = vst.msk [vmem:[%s2341_s17 + $0x380] sm:$0x1] %vm661_vm3, %v1673_v44  ;;  %2230 = vst.msk [vmem:[%s2341_s17 + $0x390] sm:$0x1] %vm661_vm3, %v1674_v9  ;;  %v1403_v24 = vrot.slane %v4013_v5, 1  ;;  %v1406_v15 = vrot.slane %v4016_v37, 1  ;;  %v1679_v54 = vmax.f32 %v3994_v61, %v1435_v23 }
  0xbb   : > { %2220 = vst.msk [vmem:[%s2341_s17 + $0x3f9] sm:$0x3f] %vm597_vm5, %v1616_v2  ;;  %v4057_v34 = vsel %vm370_vm1, %v1396_v39, %v1397_v6  ;;  %v4060_v33 = vmax.f32 %v3997_v52, %v1397_v6  ;;  %v1409_v63 = vrot.slane %v4029_v62, 1  ;;  %v4073_v39 = vsel %vm370_vm1, %v1399_v26, %v1400_v32  ;;  %v4084_v9 = vld [vmem:[%s2341_s17 + $0x378] sm:$0xff]  ;;  %v4205_v56 = vld [vmem:[%s2341_s17 + $0x3e8] sm:$0xff] }
  0xbc   : > { %2219 = vst.msk [vmem:[%s2341_s17 + $0x3f1] sm:$0xff] %vm180_vm0, %v1615_v8  ;;  %v4076_v8 = vmax.f32 %v4010_v10, %v1400_v32  ;;  %v4081_v44 = vsel %vm370_vm1, %v1402_v25, %v1403_v24  ;;  %v4102_v25 = vmax.f32 %v4013_v5, %v1403_v24  ;;  %v4107_v6 = vsel %vm370_vm1, %v1405_v28, %v1406_v15  ;;  %v4113_v32 = vld [vmem:[%s2341_s17 + $0x3b8] sm:$0xff] }
  0xbd   : > { %2231 = vst.msk [vmem:[%s2341_s17 + $0x3a0] sm:$0x1] %vm661_vm3, %v1675_v31  ;;  %2232 = vst.msk [vmem:[%s2341_s17 + $0x3b0] sm:$0x1] %vm661_vm3, %v1676_v60  ;;  %v4087_v31 = vld [vmem:[%s2341_s17 + $0x388] sm:$0xff]  ;;  %v4090_v60 = vld [vmem:[%s2341_s17 + $0x398] sm:$0xff]  ;;  %v4124_v24 = vmax.f32 %v4016_v37, %v1406_v15  ;;  %v4129_v28 = vsel %vm370_vm1, %v1408_v4, %v1409_v63  ;;  %v4132_v20 = vmax.f32 %v4029_v62, %v1409_v63 }
  0xbe   : > { %2233 = vst.msk [vmem:[%s2341_s17 + $0x3c0] sm:$0x1] %vm661_vm3, %v1677_v49  ;;  %2234 = vst.msk [vmem:[%s2341_s17 + $0x3d0] sm:$0x1] %vm661_vm3, %v1678_v14  ;;  %v4110_v14 = vld [vmem:[%s2341_s17 + $0x3a8] sm:$0xff]  ;;  %v1412_v13 = vrot.slane %v4064_v19, 1 }
  0xbf   : > { %2235 = vst.msk [vmem:[%s2341_s17 + $0x3e0] sm:$0x1] %vm661_vm3, %v1679_v54  ;;  %v4116_v54 = vld [vmem:[%s2341_s17 + $0x3c8] sm:$0xff]  ;;  %v1415_v43 = vrot.slane %v4084_v9, 1  ;;  %v1418_v15 = vrot.slane %v4087_v31, 1  ;;  %v1421_v4 = vrot.slane %v4090_v60, 1 }
  0xc0   : > { %2238 = vst.msk [vmem:[%s2341_s17 + $0x319] sm:$0x40] %vm678_vm4, %v4060_v33  ;;  %2239 = vst.msk [vmem:[%s2341_s17 + $0x329] sm:$0x40] %vm678_vm4, %v4076_v8  ;;  %v1424_v63 = vrot.slane %v4110_v14, 1  ;;  %v1427_v41 = vrot.slane %v4113_v32, 1  ;;  %v4155_v38 = vsel %vm370_vm1, %v1411_v21, %v1412_v13  ;;  %v4158_v36 = vmax.f32 %v4064_v19, %v1412_v13 }
  0xc1   : > { %2240 = vst.msk [vmem:[%s2341_s17 + $0x339] sm:$0x40] %vm678_vm4, %v4102_v25  ;;  %2241 = vst.msk [vmem:[%s2341_s17 + $0x349] sm:$0x40] %vm678_vm4, %v4124_v24  ;;  %v1430_v42 = vrot.slane %v4116_v54, 1  ;;  %v4163_v58 = vsel %vm370_vm1, %v1414_v3, %v1415_v43  ;;  %v4166_v27 = vmax.f32 %v4084_v9, %v1415_v43  ;;  %v4175_v21 = vsel %vm370_vm1, %v1417_v46, %v1418_v15 }
  0xc2   : > { %2242 = vst.msk [vmem:[%s2341_s17 + $0x359] sm:$0x40] %vm678_vm4, %v4132_v20  ;;  %v4178_v13 = vmax.f32 %v4087_v31, %v1418_v15  ;;  %2243 = vst.msk [vmem:[%s2341_s17 + $0x369] sm:$0x40] %vm678_vm4, %v4158_v36  ;;  %v4191_v43 = vsel %vm370_vm1, %v1420_v17, %v1421_v4  ;;  %v4194_v46 = vmax.f32 %v4090_v60, %v1421_v4  ;;  %v1433_v17 = vrot.slane %v4202_v18, 1 }
  0xc3   : > { %2244 = vst.msk [vmem:[%s2341_s17 + $0x379] sm:$0x40] %vm678_vm4, %v4166_v27  ;;  %v4199_v15 = vsel %vm370_vm1, %v1423_v12, %v1424_v63  ;;  %v4215_v3 = vmax.f32 %v4110_v14, %v1424_v63  ;;  %v4220_v12 = vsel %vm370_vm1, %v1426_v1, %v1427_v41  ;;  %v4228_v26 = vmax.f32 %v4113_v32, %v1427_v41 }
  0xc4   : > { %2245 = vst.msk [vmem:[%s2341_s17 + $0x389] sm:$0x40] %vm678_vm4, %v4178_v13  ;;  %2246 = vst.msk [vmem:[%s2341_s17 + $0x399] sm:$0x40] %vm678_vm4, %v4194_v46  ;;  %v4233_v4 = vsel %vm370_vm1, %v1429_v40, %v1430_v42  ;;  %v4236_v63 = vmax.f32 %v4116_v54, %v1430_v42  ;;  %v1436_v49 = vrot.slane %v4205_v56, 1  ;;  %v1509_v41 = vrot.slane %v3997_v52, 2 }
  0xc5   : > { %2247 = vst.msk [vmem:[%s2341_s17 + $0x3a9] sm:$0x40] %vm678_vm4, %v4215_v3  ;;  %2248 = vst.msk [vmem:[%s2341_s17 + $0x3b9] sm:$0x40] %vm678_vm4, %v4228_v26  ;;  %v1512_v42 = vrot.slane %v4010_v10, 2  ;;  %v1515_v40 = vrot.slane %v4013_v5, 2  ;;  %v4259_v52 = vsel %vm370_vm1, %v1432_v0, %v1433_v17  ;;  %v4262_v47 = vmax.f32 %v4202_v18, %v1433_v17 }
  0xc6   : > { %2249 = vst.msk [vmem:[%s2341_s17 + $0x3c9] sm:$0x40] %vm678_vm4, %v4236_v63  ;;  %v1518_v1 = vrot.slane %v4016_v37, 2  ;;  %v1521_v50 = vrot.slane %v4029_v62, 2  ;;  %v4267_v2 = vsel %vm370_vm1, %v1435_v23, %v1436_v49  ;;  %v4270_v10 = vmax.f32 %v4205_v56, %v1436_v49 }
  0xc7   : > { %v1510_v0 = vsel %vm483_vm2, %v1508_v22, %v1509_v41  ;;  %v1588_v62 = vmax.f32 %v4060_v33, %v1509_v41  ;;  %2250 = vst.msk [vmem:[%s2341_s17 + $0x3d9] sm:$0x40] %vm678_vm4, %v4262_v47  ;;  %v4534_v23 = vmax.f32 %v3860_v51, %v4057_v34  ;;  %v4535_v17 = vrot.slane %v3867_v11, 2 }
  0xc8   : > { %2251 = vst.msk [vmem:[%s2341_s17 + $0x3e9] sm:$0x40] %vm678_vm4, %v4270_v10  ;;  %v1590_v22 = vmax.f32 %v4076_v8, %v1512_v42  ;;  %v4536_v33 = vrot.slane %v3876_v48, 2  ;;  %v4537_v5 = vmax.f32 %v3867_v11, %v4073_v39  ;;  %v4538_v34 = vmax.f32 %v3876_v48, %v4081_v44 }
  0xc9   : > { %v1587_v49 = vmax.f32 %v4534_v23, %v1510_v0  ;;  %v1513_v37 = vsel %vm483_vm2, %v4535_v17, %v1512_v42  ;;  %2192 = vst.msk [vmem:[%s2341_s17 + $0x319] sm:$0x3f] %vm597_vm5, %v1588_v62  ;;  %v1592_v23 = vmax.f32 %v4102_v25, %v1515_v40  ;;  %v4539_v17 = vrot.slane %v3885_v16, 2 }
  0xca   : > { %v1516_v41 = vsel %vm483_vm2, %v4536_v33, %v1515_v40  ;;  %v1589_v51 = vmax.f32 %v4537_v5, %v1513_v37  ;;  %2194 = vst.msk [vmem:[%s2341_s17 + $0x329] sm:$0x3f] %vm597_vm5, %v1590_v22  ;;  %v4540_v11 = vmax.f32 %v3885_v16, %v4107_v6  ;;  %v1594_v48 = vmax.f32 %v4124_v24, %v1518_v1 }
  0xcb   : > { %v1591_v0 = vmax.f32 %v4538_v34, %v1516_v41  ;;  %v1519_v8 = vsel %vm483_vm2, %v4539_v17, %v1518_v1  ;;  %2191 = vst.msk [vmem:[%s2341_s17 + $0x311] sm:$0xff] %vm180_vm0, %v1587_v49  ;;  %v4541_v44 = vrot.slane %v3893_v59, 2  ;;  %v1596_v42 = vmax.f32 %v4132_v20, %v1521_v50 }
  0xcc   : > { %v1593_v39 = vmax.f32 %v4540_v11, %v1519_v8  ;;  %2193 = vst.msk [vmem:[%s2341_s17 + $0x321] sm:$0xff] %vm180_vm0, %v1589_v51  ;;  %v4542_v40 = vmax.f32 %v3893_v59, %v4129_v28  ;;  %v1524_v6 = vrot.slane %v4064_v19, 2  ;;  %v1527_v24 = vrot.slane %v4084_v9, 2 }
  0xcd   : > { %v1522_v25 = vsel %vm483_vm2, %v4541_v44, %v1521_v50  ;;  %2196 = vst.msk [vmem:[%s2341_s17 + $0x339] sm:$0x3f] %vm597_vm5, %v1592_v23  ;;  %v1530_v1 = vrot.slane %v4087_v31, 2  ;;  %2198 = vst.msk [vmem:[%s2341_s17 + $0x349] sm:$0x3f] %vm597_vm5, %v1594_v48  ;;  %v1533_v50 = vrot.slane %v4090_v60, 2  ;;  %v4546_v37 = vmax.f32 %v3922_v53, %v4163_v58 }
  0xce   : > { %2195 = vst.msk [vmem:[%s2341_s17 + $0x331] sm:$0xff] %vm180_vm0, %v1591_v0  ;;  %v1595_v16 = vmax.f32 %v4542_v40, %v1522_v25  ;;  %2197 = vst.msk [vmem:[%s2341_s17 + $0x341] sm:$0xff] %vm180_vm0, %v1593_v39  ;;  %v1536_v20 = vrot.slane %v4110_v14, 2  ;;  %v1539_v59 = vrot.slane %v4113_v32, 2  ;;  %v1542_v19 = vrot.slane %v4116_v54, 2 }
  0xcf   : > { %2200 = vst.msk [vmem:[%s2341_s17 + $0x359] sm:$0x3f] %vm597_vm5, %v1596_v42  ;;  %v4543_v9 = vrot.slane %v3905_v55, 2  ;;  %v1598_v28 = vmax.f32 %v4158_v36, %v1524_v6  ;;  %v4544_v5 = vrot.slane %v3922_v53, 2  ;;  %v1600_v14 = vmax.f32 %v4166_v27, %v1527_v24 }
  0xd0   : > { %2199 = vst.msk [vmem:[%s2341_s17 + $0x351] sm:$0xff] %vm180_vm0, %v1595_v16  ;;  %v4545_v32 = vmax.f32 %v3905_v55, %v4155_v38  ;;  %v4547_v49 = vrot.slane %v3941_v35, 2  ;;  %v1602_v36 = vmax.f32 %v4178_v13, %v1530_v1  ;;  %v4548_v55 = vmax.f32 %v3941_v35, %v4175_v21 }
  0xd1   : > { %v1525_v31 = vsel %vm483_vm2, %v4543_v9, %v1524_v6  ;;  %v1528_v60 = vsel %vm483_vm2, %v4544_v5, %v1527_v24  ;;  %2202 = vst.msk [vmem:[%s2341_s17 + $0x369] sm:$0x3f] %vm597_vm5, %v1598_v28  ;;  %2204 = vst.msk [vmem:[%s2341_s17 + $0x379] sm:$0x3f] %vm597_vm5, %v1600_v14  ;;  %v4549_v38 = vrot.slane %v3954_v29, 2  ;;  %v1604_v58 = vmax.f32 %v4194_v46, %v1533_v50 }
  0xd2   : > { %v1597_v54 = vmax.f32 %v4545_v32, %v1525_v31  ;;  %v1599_v62 = vmax.f32 %v4546_v37, %v1528_v60  ;;  %v1531_v22 = vsel %vm483_vm2, %v4547_v49, %v1530_v1  ;;  %v4550_v33 = vrot.slane %v3957_v30, 2  ;;  %2206 = vst.msk [vmem:[%s2341_s17 + $0x389] sm:$0x3f] %vm597_vm5, %v1602_v36 }
  0xd3   : > { %v1601_v27 = vmax.f32 %v4548_v55, %v1531_v22  ;;  %v1534_v53 = vsel %vm483_vm2, %v4549_v38, %v1533_v50  ;;  %v4551_v35 = vmax.f32 %v3954_v29, %v4191_v43  ;;  %v4552_v41 = vmax.f32 %v3957_v30, %v4199_v15  ;;  %2208 = vst.msk [vmem:[%s2341_s17 + $0x399] sm:$0x3f] %vm597_vm5, %v1604_v58 }
  0xd4   : > { %v1537_v13 = vsel %vm483_vm2, %v4550_v33, %v1536_v20  ;;  %2201 = vst.msk [vmem:[%s2341_s17 + $0x361] sm:$0xff] %vm180_vm0, %v1597_v54  ;;  %2203 = vst.msk [vmem:[%s2341_s17 + $0x371] sm:$0xff] %vm180_vm0, %v1599_v62  ;;  %v1606_v51 = vmax.f32 %v4215_v3, %v1536_v20  ;;  %v4553_v34 = vrot.slane %v3962_v57, 2  ;;  %v4554_v29 = vmax.f32 %v3962_v57, %v4220_v12 }
  0xd5   : > { %v1603_v21 = vmax.f32 %v4551_v35, %v1534_v53  ;;  %v1605_v46 = vmax.f32 %v4552_v41, %v1537_v13  ;;  %2205 = vst.msk [vmem:[%s2341_s17 + $0x381] sm:$0xff] %vm180_vm0, %v1601_v27  ;;  %v1608_v30 = vmax.f32 %v4228_v26, %v1539_v59  ;;  %v4555_v15 = vrot.slane %v3974_v7, 2 }
  0xd6   : > { %v1540_v0 = vsel %vm483_vm2, %v4553_v34, %v1539_v59  ;;  %v1610_v23 = vmax.f32 %v4236_v63, %v1542_v19  ;;  %2210 = vst.msk [vmem:[%s2341_s17 + $0x3a9] sm:$0x3f] %vm597_vm5, %v1606_v51  ;;  %v4556_v57 = vmax.f32 %v3974_v7, %v4233_v4  ;;  %v1545_v26 = vrot.slane %v4202_v18, 2 }
  0xd7   : > { %v1607_v43 = vmax.f32 %v4554_v29, %v1540_v0  ;;  %v1543_v3 = vsel %vm483_vm2, %v4555_v15, %v1542_v19  ;;  %2207 = vst.msk [vmem:[%s2341_s17 + $0x391] sm:$0xff] %vm180_vm0, %v1603_v21  ;;  %2209 = vst.msk [vmem:[%s2341_s17 + $0x3a1] sm:$0xff] %vm180_vm0, %v1605_v46  ;;  %v1548_v17 = vrot.slane %v4205_v56, 2  ;;  %v4557_v63 = vrot.slane %v3984_v45, 2 }
  0xd8   : > { %v1609_v12 = vmax.f32 %v4556_v57, %v1543_v3  ;;  %2212 = vst.msk [vmem:[%s2341_s17 + $0x3b9] sm:$0x3f] %vm597_vm5, %v1608_v30  ;;  %2214 = vst.msk [vmem:[%s2341_s17 + $0x3c9] sm:$0x3f] %vm597_vm5, %v1610_v23  ;;  %v1612_v7 = vmax.f32 %v4262_v47, %v1545_v26  ;;  %v4558_v4 = vrot.slane %v3994_v61, 2  ;;  %v4559_v11 = vmax.f32 %v3984_v45, %v4259_v52 }
  0xd9   : > { %2211 = vst.msk [vmem:[%s2341_s17 + $0x3b1] sm:$0xff] %vm180_vm0, %v1607_v43  ;;  %v1546_v8 = vsel %vm483_vm2, %v4557_v63, %v1545_v26  ;;  %v1614_v56 = vmax.f32 %v4270_v10, %v1548_v17  ;;  %v4560_v48 = vmax.f32 %v3994_v61, %v4267_v2 }
  0xda   : > { %2213 = vst.msk [vmem:[%s2341_s17 + $0x3c1] sm:$0xff] %vm180_vm0, %v1609_v12  ;;  %v1549_v18 = vsel %vm483_vm2, %v4558_v4, %v1548_v17  ;;  %v1611_v39 = vmax.f32 %v4559_v11, %v1546_v8 }
  0xdb   : > { %v1613_v44 = vmax.f32 %v4560_v48, %v1549_v18  ;;  %2216 = vst.msk [vmem:[%s2341_s17 + $0x3d9] sm:$0x3f] %vm597_vm5, %v1612_v7  ;;  %2218 = vst.msk [vmem:[%s2341_s17 + $0x3e9] sm:$0x3f] %vm597_vm5, %v1614_v56 }
  0xdc   : > { %2215 = vst.msk [vmem:[%s2341_s17 + $0x3d1] sm:$0xff] %vm180_vm0, %v1611_v39 }
  0xdd   : > { %2217 = vst.msk [vmem:[%s2341_s17 + $0x3e1] sm:$0xff] %vm180_vm0, %v1613_v44 }
  0xde PF: > { %s11_s8 = sadd.s32 1, %s2303_s8   ;;  %s4561_s6 = smov %s2299_s7 }
  0xdf   : > { %p8_p5 = scmp.ge.s32.totalorder %s11_s8, 4   ;;  %s4562_s7 = smov %s4564_s9 }
  0xe1   :  { %10 = sbr.rel (!%p8_p5) target bundleno = 2 (0x2), region = 63 }

</bundles_post_ra>
